<compile_context>
chip_gen: v7x
topology: tpu7x:2x2x1
jax: 0.10.0
libtpu: 0.0.40
codegen_flags: <defaults>
</compile_context>

<pallas_src>
import functools

import jax
import jax.numpy as jnp
from jax import lax
from jax.experimental import pallas as pl
from jax.experimental.pallas import tpu as pltpu


def _wsi_pool_kernel(
    x_ref,       # (TILE_N, D_in) bf16   streamed tile of x
    w1_ref,      # (D_in, H)      bf16   fc: Linear(input_dim, hidden_dim)
    b1_ref,      # (1, H)         f32
    w2_ref,      # (H, H)         bf16   attention_net[0]
    b2_ref,      # (1, H)         f32
    w3t_ref,     # (1, H)         bf16   attention_net[2].weight (row form; bias dropped)
    scores_ref,  # out (1, 1, TILE_N) f32  raw (pre-softmax, masked) scores, lane-dense
    m_ref,       # out (1, 1, 1)  f32   per-core running max
    l_ref,       # out (1, 1, 1)  f32   per-core softmax denominator
    acc_ref,     # out (1, 1, H)  f32   per-core un-normalized context
    *,
    tile_n,
    tiles_per_core,
    n_valid,
):
    c = pl.program_id(0)   # TensorCore split ("parallel")
    i = pl.program_id(1)   # N-tile reduction ("arbitrary")

    @pl.when(i == 0)
    def _init():
        m_ref[...] = jnp.full(m_ref.shape, -jnp.inf, jnp.float32)
        l_ref[...] = jnp.zeros(l_ref.shape, jnp.float32)
        acc_ref[...] = jnp.zeros(acc_ref.shape, jnp.float32)

    # h = ReLU(x @ W1 + b1): bf16 MXU feed, f32 accumulate.
    h = jnp.dot(x_ref[...], w1_ref[...], preferred_element_type=jnp.float32)
    h = jnp.maximum(h + b1_ref[...], 0.0)                     # (TILE_N, H) f32
    h_bf = h.astype(jnp.bfloat16)

    # attention_net: Linear -> Tanh -> Linear (b3 is softmax-invariant).
    z = jnp.tanh(
        jnp.dot(h_bf, w2_ref[...], preferred_element_type=jnp.float32)
        + b2_ref[...]
    )
    # Row-form scores: (1, H) x (TILE_N, H) contracted on H -> (1, TILE_N).
    s_row = lax.dot_general(
        w3t_ref[...], z.astype(jnp.bfloat16),
        dimension_numbers=(((1,), (1,)), ((), ())),
        preferred_element_type=jnp.float32,
    )

    # Mask rows past the true N (wrapper pads x); store lane-dense scores.
    col = lax.broadcasted_iota(jnp.int32, (1, tile_n), 1)
    row = (c * tiles_per_core + i) * tile_n + col
    s_row = jnp.where(row < n_valid, s_row, -jnp.inf)
    scores_ref[0] = s_row

    # Online (flash-style) softmax accumulation into the resident out blocks.
    m_prev = m_ref[0]                                          # (1, 1)
    m_new = jnp.maximum(m_prev, jnp.max(s_row, axis=1, keepdims=True))
    alpha = jnp.exp(m_prev - m_new)                            # (1, 1)
    e_row = jnp.exp(s_row - m_new)                             # (1, TILE_N); 0 on padding
    l_ref[0] = alpha * l_ref[0] + jnp.sum(e_row, axis=1, keepdims=True)
    # Weighted context update as an MXU matmul: (1,TILE_N) @ (TILE_N, H).
    acc_ref[0] = alpha * acc_ref[0] + jnp.dot(
        e_row.astype(jnp.bfloat16), h_bf, preferred_element_type=jnp.float32)
    m_ref[0] = m_new


def wsi_attention_pooler(x, params, *, tile_n=1024):
    """x: (N, input_dim) float32. params: pre-transposed (in, out) weights.

    Returns (wsi_level_feature (output_dim,), attention_scores (N, 1)).
    """
    n, d_in = x.shape
    h_dim = params["w1"].shape[1]

    # Tile size: multiple of 256 (full MXU rows / clean bf16 packing).
    tile_n = max(256, ((min(int(tile_n), n) + 255) // 256) * 256)
    num_tiles = (n + tile_n - 1) // tile_n
    # 2-way split across TensorCores (v7x / megacore); harmless on 1-TC chips.
    num_cores = min(2, num_tiles)
    tiles_per_core = (num_tiles + num_cores - 1) // num_cores
    num_row_blocks = num_cores * tiles_per_core
    n_pad = num_row_blocks * tile_n

    # bf16 feeds for everything that hits the MXU; biases stay f32.
    x_pad = jnp.pad(x, ((0, n_pad - n), (0, 0))).astype(jnp.bfloat16)
    w1 = params["w1"].astype(jnp.bfloat16)
    w2 = params["w2"].astype(jnp.bfloat16)
    w3t = params["w3"].reshape(1, h_dim).astype(jnp.bfloat16)
    b1 = params["b1"].astype(jnp.float32)
    b2 = params["b2"].astype(jnp.float32)

    # VMEM budget estimate (double-buffered tiles + resident weights +
    # in-kernel f32 intermediates), clamped to stay inside v7x's 64 MiB.
    vmem_need = (
        2 * tile_n * d_in * 2                       # x tile (bf16, double-buffered)
        + 4 * (d_in + h_dim + 3) * h_dim            # weights/biases (double-buffered)
        + 8 * (tile_n + h_dim + 2)                  # outputs (double-buffered)
        + 6 * 4 * tile_n * h_dim                    # h / z / e intermediates headroom
    )
    vmem_limit = int(min(48 * 1024 * 1024, max(32 * 1024 * 1024, 2 * vmem_need)))

    cost = pl.CostEstimate(
        flops=(2 * n_pad * d_in * h_dim          # x @ W1
               + 2 * n_pad * h_dim * h_dim       # h @ W2
               + 2 * n_pad * h_dim               # z @ w3
               + 2 * n_pad * h_dim),             # e @ h
        transcendentals=n_pad * (h_dim + 1),
        bytes_accessed=(n_pad * d_in * 2
                        + (d_in * h_dim + h_dim * h_dim + h_dim) * 2
                        + 4 * h_dim * 4
                        + n_pad * 4
                        + num_cores * (h_dim + 2) * 4),
    )

    kernel = functools.partial(
        _wsi_pool_kernel, tile_n=tile_n, tiles_per_core=tiles_per_core, n_valid=n)

    scores, m_part, l_part, acc_part = pl.pallas_call(
        kernel,
        out_shape=(
            jax.ShapeDtypeStruct((num_row_blocks, 1, tile_n), jnp.float32),
            jax.ShapeDtypeStruct((num_cores, 1, 1), jnp.float32),
            jax.ShapeDtypeStruct((num_cores, 1, 1), jnp.float32),
            jax.ShapeDtypeStruct((num_cores, 1, h_dim), jnp.float32),
        ),
        grid_spec=pltpu.PrefetchScalarGridSpec(
            num_scalar_prefetch=0,
            grid=(num_cores, tiles_per_core),
            in_specs=[
                pl.BlockSpec((tile_n, d_in), lambda c, i: (c * tiles_per_core + i, 0)),
                pl.BlockSpec((d_in, h_dim), lambda c, i: (0, 0)),   # W1 resident
                pl.BlockSpec((1, h_dim), lambda c, i: (0, 0)),      # b1
                pl.BlockSpec((h_dim, h_dim), lambda c, i: (0, 0)),  # W2
                pl.BlockSpec((1, h_dim), lambda c, i: (0, 0)),      # b2
                pl.BlockSpec((1, h_dim), lambda c, i: (0, 0)),      # w3 (row form)
            ],
            out_specs=[
                pl.BlockSpec((1, 1, tile_n),
                             lambda c, i: (c * tiles_per_core + i, 0, 0)),
                pl.BlockSpec((1, 1, 1), lambda c, i: (c, 0, 0)),
                pl.BlockSpec((1, 1, 1), lambda c, i: (c, 0, 0)),
                pl.BlockSpec((1, 1, h_dim), lambda c, i: (c, 0, 0)),
            ],
        ),
        compiler_params=pltpu.CompilerParams(
            dimension_semantics=("parallel", "arbitrary"),
            vmem_limit_bytes=vmem_limit,
        ),
        cost_estimate=cost,
    )(x_pad, w1, b1, w2, b2, w3t)

    # Tiny plain-JAX epilogue: merge per-core partials (log-sum-exp), apply
    # the pooler fc + ReLU, and normalize the stored raw scores exactly.
    m_g = jnp.max(m_part)                                   # scalar
    scale = jnp.exp(m_part[:, 0, 0] - m_g)                  # (num_cores,)
    l_g = jnp.sum(scale * l_part[:, 0, 0])                  # scalar
    ctx = jnp.sum(scale[:, None] * acc_part[:, 0, :], axis=0) / l_g   # (H,)

    feat = jnp.maximum(ctx @ params["w4"] + params["b4"][0], 0.0)     # (D_out,)
    attn = (jnp.exp(scores.reshape(-1) - m_g) / l_g)[:n].reshape(n, 1)
    return feat, attn


def init_params(key, input_dim, hidden_dim, output_dim):
    ks = jax.random.split(key, 9)
    scale = 0.05
    return {
        # stored as (in, out) — transpose of PyTorch's (out, in)
        "w1": scale * jax.random.normal(ks[0], (input_dim, hidden_dim), jnp.float32),
        "b1": scale * jax.random.normal(ks[1], (1, hidden_dim), jnp.float32),
        "w2": scale * jax.random.normal(ks[2], (hidden_dim, hidden_dim), jnp.float32),
        "b2": scale * jax.random.normal(ks[3], (1, hidden_dim), jnp.float32),
        "w3": scale * jax.random.normal(ks[4], (hidden_dim, 1), jnp.float32),
        "b3": scale * jax.random.normal(ks[5], (1, 1), jnp.float32),
        "w4": scale * jax.random.normal(ks[6], (hidden_dim, output_dim), jnp.float32),
        "b4": scale * jax.random.normal(ks[7], (1, output_dim), jnp.float32),
    }


def reference_forward(x, p):
    """Pure-JAX reference mirroring the PyTorch forward (eval mode).

    Mirrors the kernel's bf16 MXU feeds (x, W1, h, W2, z, w3) so the
    comparison isolates kernel correctness; keeps b3 (the kernel drops it,
    which is a softmax no-op)."""
    q = lambda a: a.astype(jnp.bfloat16).astype(jnp.float32)
    h = jnp.maximum(q(x) @ q(p["w1"]) + p["b1"], 0.0)
    hq = q(h)                          # kernel feeds h to the MXU in bf16
    z = jnp.tanh(hq @ q(p["w2"]) + p["b2"])
    s = q(z) @ q(p["w3"]) + p["b3"]
    a = jax.nn.softmax(s, axis=0)
    ctx = jnp.sum(a * hq, axis=0)
    feat = jnp.maximum(ctx @ p["w4"] + p["b4"][0], 0.0)
    return feat, a


if __name__ == "__main__":
    # Small demo shapes; tile_n=256 with N=600 forces 3 real tiles -> the
    # 2-core split (2 tiles on core 0, 1 real + 1 fully-padded tile on core 1)
    # plus a partially padded tile.
    N, INPUT_DIM, HIDDEN_DIM, OUTPUT_DIM = 600, 256, 128, 128
    TILE_N = 256

    key = jax.random.PRNGKey(0)
    k_x, k_p = jax.random.split(key)
    x = jax.random.normal(k_x, (N, INPUT_DIM), jnp.float32)
    params = init_params(k_p, INPUT_DIM, HIDDEN_DIM, OUTPUT_DIM)

    feat, attn = wsi_attention_pooler(x, params, tile_n=TILE_N)
    jax.block_until_ready((feat, attn))

    ref_feat, ref_attn = reference_forward(x, params)
    assert feat.shape == (OUTPUT_DIM,)
    assert attn.shape == (N, 1)
    assert jnp.allclose(feat, ref_feat, atol=2e-3, rtol=2e-2), (
        float(jnp.max(jnp.abs(feat - ref_feat))))
    assert jnp.allclose(attn, ref_attn, atol=1e-4, rtol=2e-2), (
        float(jnp.max(jnp.abs(attn - ref_attn))))
    assert jnp.allclose(jnp.sum(attn), 1.0, atol=1e-4)

    print("KERNEL_OK")
</pallas_src>

<mosaic_0001>
module attributes {stable_mosaic.version = 11 : i64} {
  func.func @_wsi_pool_kernel(%arg0: i32, %arg1: i32, %arg2: memref<256x256xbf16, #tpu.memory_space<vmem>>, %arg3: memref<256x128xbf16, #tpu.memory_space<vmem>>, %arg4: memref<1x128xf32, #tpu.memory_space<vmem>>, %arg5: memref<128x128xbf16, #tpu.memory_space<vmem>>, %arg6: memref<1x128xf32, #tpu.memory_space<vmem>>, %arg7: memref<1x128xbf16, #tpu.memory_space<vmem>>, %arg8: memref<1x1x256xf32, #tpu.memory_space<vmem>>, %arg9: memref<1x1x1xf32, #tpu.memory_space<vmem>>, %arg10: memref<1x1x1xf32, #tpu.memory_space<vmem>>, %arg11: memref<1x1x128xf32, #tpu.memory_space<vmem>>) attributes {dimension_semantics = [#tpu.dimension_semantics<parallel>, #tpu.dimension_semantics<arbitrary>], iteration_bounds = array<i64: 2, 2>, scalar_prefetch = 0 : i64, scratch_operands = 0 : i64, tpu.core_type = #tpu.core_type<tc>, window_params = [{transform_indices = @transform_0, window_bounds = array<i64: 256, 256>}, {pipeline_mode = #tpu.pipeline_mode<synchronous>, transform_indices = @transform_1, window_bounds = array<i64: 256, 128>}, {pipeline_mode = #tpu.pipeline_mode<synchronous>, transform_indices = @transform_2, window_bounds = array<i64: 1, 128>}, {pipeline_mode = #tpu.pipeline_mode<synchronous>, transform_indices = @transform_3, window_bounds = array<i64: 128, 128>}, {pipeline_mode = #tpu.pipeline_mode<synchronous>, transform_indices = @transform_4, window_bounds = array<i64: 1, 128>}, {pipeline_mode = #tpu.pipeline_mode<synchronous>, transform_indices = @transform_5, window_bounds = array<i64: 1, 128>}, {transform_indices = @transform_6, window_bounds = array<i64: 1, 1, 256>}, {transform_indices = @transform_7, window_bounds = array<i64: 1, 1, 1>}, {transform_indices = @transform_8, window_bounds = array<i64: 1, 1, 1>}, {transform_indices = @transform_9, window_bounds = array<i64: 1, 1, 128>}]} {
    %c0_i32 = arith.constant 0 : i32
    %0 = arith.cmpi eq, %arg1, %c0_i32 : i32
    %1 = arith.extui %0 : i1 to i32
    %c0_i32_0 = arith.constant 0 : i32
    %2 = arith.cmpi ne, %1, %c0_i32_0 : i32
    scf.if %2 {
      %cst_40 = arith.constant 0xFF800000 : f32
      %66 = vector.broadcast %cst_40 : f32 to vector<1x1x1xf32>
      %c0_41 = arith.constant 0 : index
      %c0_42 = arith.constant 0 : index
      %c0_43 = arith.constant 0 : index
      %67 = vector.load %arg9[%c0_41, %c0_42, %c0_43] : memref<1x1x1xf32, #tpu.memory_space<vmem>>, vector<1x1x1xf32>
      tpu.vector_store %arg9[%c0_41, %c0_42, %c0_43], %66 {strides = array<i32>} : memref<1x1x1xf32, #tpu.memory_space<vmem>>, vector<1x1x1xf32>,
      %cst_44 = arith.constant 0.000000e+00 : f32
      %68 = vector.broadcast %cst_44 : f32 to vector<1x1x1xf32>
      %c0_45 = arith.constant 0 : index
      %c0_46 = arith.constant 0 : index
      %c0_47 = arith.constant 0 : index
      %69 = vector.load %arg10[%c0_45, %c0_46, %c0_47] : memref<1x1x1xf32, #tpu.memory_space<vmem>>, vector<1x1x1xf32>
      tpu.vector_store %arg10[%c0_45, %c0_46, %c0_47], %68 {strides = array<i32>} : memref<1x1x1xf32, #tpu.memory_space<vmem>>, vector<1x1x1xf32>,
      %cst_48 = arith.constant 0.000000e+00 : f32
      %70 = vector.broadcast %cst_48 : f32 to vector<1x1x128xf32>
      %c0_49 = arith.constant 0 : index
      %c0_50 = arith.constant 0 : index
      %c0_51 = arith.constant 0 : index
      %71 = vector.load %arg11[%c0_49, %c0_50, %c0_51] : memref<1x1x128xf32, #tpu.memory_space<vmem>>, vector<1x1x128xf32>
      tpu.vector_store %arg11[%c0_49, %c0_50, %c0_51], %70 {strides = array<i32>} : memref<1x1x128xf32, #tpu.memory_space<vmem>>, vector<1x1x128xf32>,
    } else {
    }
    %c0 = arith.constant 0 : index
    %c0_1 = arith.constant 0 : index
    %3 = vector.load %arg2[%c0, %c0_1] : memref<256x256xbf16, #tpu.memory_space<vmem>>, vector<256x256xbf16>
    %c0_2 = arith.constant 0 : index
    %c0_3 = arith.constant 0 : index
    %4 = vector.load %arg3[%c0_2, %c0_3] : memref<256x128xbf16, #tpu.memory_space<vmem>>, vector<256x128xbf16>
    %cst = arith.constant dense<0.000000e+00> : vector<256x128xf32>
    %5 = tpu.matmul %3, %4, %cst {dimension_numbers = #tpu.dot_dimension_numbers<[1], [0], [0], [1], [0, 0, 1, 1], [], []>} : vector<256x256xbf16>, vector<256x128xbf16>, vector<256x128xf32> -> vector<256x128xf32>
    %c0_4 = arith.constant 0 : index
    %c0_5 = arith.constant 0 : index
    %6 = vector.load %arg4[%c0_4, %c0_5] : memref<1x128xf32, #tpu.memory_space<vmem>>, vector<1x128xf32>
    %7 = vector.broadcast %6 : vector<1x128xf32> to vector<256x128xf32>
    %8 = arith.addf %5, %7 : vector<256x128xf32>
    %cst_6 = arith.constant 0.000000e+00 : f32
    %9 = vector.broadcast %cst_6 : f32 to vector<256x128xf32>
    %10 = arith.maximumf %8, %9 : vector<256x128xf32>
    %11 = arith.truncf %10 : vector<256x128xf32> to vector<256x128xbf16>
    %c0_7 = arith.constant 0 : index
    %c0_8 = arith.constant 0 : index
    %12 = vector.load %arg5[%c0_7, %c0_8] : memref<128x128xbf16, #tpu.memory_space<vmem>>, vector<128x128xbf16>
    %cst_9 = arith.constant dense<0.000000e+00> : vector<256x128xf32>
    %13 = tpu.matmul %11, %12, %cst_9 {dimension_numbers = #tpu.dot_dimension_numbers<[1], [0], [0], [1], [0, 0, 1, 1], [], []>} : vector<256x128xbf16>, vector<128x128xbf16>, vector<256x128xf32> -> vector<256x128xf32>
    %c0_10 = arith.constant 0 : index
    %c0_11 = arith.constant 0 : index
    %14 = vector.load %arg6[%c0_10, %c0_11] : memref<1x128xf32, #tpu.memory_space<vmem>>, vector<1x128xf32>
    %15 = vector.broadcast %14 : vector<1x128xf32> to vector<256x128xf32>
    %16 = arith.addf %13, %15 : vector<256x128xf32>
    %17 = math.tanh %16 : vector<256x128xf32>
    %c0_12 = arith.constant 0 : index
    %c0_13 = arith.constant 0 : index
    %18 = vector.load %arg7[%c0_12, %c0_13] : memref<1x128xbf16, #tpu.memory_space<vmem>>, vector<1x128xbf16>
    %19 = arith.truncf %17 : vector<256x128xf32> to vector<256x128xbf16>
    %cst_14 = arith.constant dense<0.000000e+00> : vector<1x256xf32>
    %20 = tpu.matmul %18, %19, %cst_14 {dimension_numbers = #tpu.dot_dimension_numbers<[1], [1], [0], [0], [0, 0, 1, 0], [], []>} : vector<1x128xbf16>, vector<256x128xbf16>, vector<1x256xf32> -> vector<1x256xf32>
    %21 = tpu.iota {dimensions = array<i32: 1>} : vector<1x256xi32>
    %c2_i32 = arith.constant 2 : i32
    %22 = arith.muli %arg0, %c2_i32 : i32
    %23 = arith.addi %22, %arg1 : i32
    %c256_i32 = arith.constant 256 : i32
    %24 = arith.muli %23, %c256_i32 : i32
    %25 = vector.broadcast %24 : i32 to vector<1x256xi32>
    %26 = arith.addi %25, %21 : vector<1x256xi32>
    %c600_i32 = arith.constant 600 : i32
    %27 = vector.broadcast %c600_i32 : i32 to vector<1x256xi32>
    %28 = arith.cmpi slt, %26, %27 : vector<1x256xi32>
    %cst_15 = arith.constant 0xFF800000 : f32
    %29 = vector.broadcast %cst_15 : f32 to vector<1x256xf32>
    %30 = arith.select %28, %20, %29 : vector<1x256xi1>, vector<1x256xf32>
    %c0_16 = arith.constant 0 : index
    %c0_17 = arith.constant 0 : index
    %c0_18 = arith.constant 0 : index
    %31 = vector.load %arg8[%c0_16, %c0_17, %c0_18] : memref<1x1x256xf32, #tpu.memory_space<vmem>>, vector<1x1x256xf32>
    %32 = vector.shape_cast %31 : vector<1x1x256xf32> to vector<1x256xf32>
    %33 = vector.shape_cast %30 : vector<1x256xf32> to vector<1x1x256xf32>
    tpu.vector_store %arg8[%c0_16, %c0_17, %c0_18], %33 {strides = array<i32>} : memref<1x1x256xf32, #tpu.memory_space<vmem>>, vector<1x1x256xf32>,
    %c0_19 = arith.constant 0 : index
    %c0_20 = arith.constant 0 : index
    %c0_21 = arith.constant 0 : index
    %34 = vector.load %arg9[%c0_19, %c0_20, %c0_21] : memref<1x1x1xf32, #tpu.memory_space<vmem>>, vector<1x1x1xf32>
    %35 = vector.shape_cast %34 : vector<1x1x1xf32> to vector<1x1xf32>
    %cst_22 = arith.constant dense<0xFF800000> : vector<1xf32>
    %36 = vector.multi_reduction <maximumf>, %30, %cst_22 [1] : vector<1x256xf32> to vector<1xf32>
    %37 = vector.shape_cast %36 : vector<1xf32> to vector<1x1xf32>
    %38 = arith.maximumf %35, %37 : vector<1x1xf32>
    %39 = arith.subf %35, %38 : vector<1x1xf32>
    %40 = math.exp %39 : vector<1x1xf32>
    %41 = vector.broadcast %38 : vector<1x1xf32> to vector<1x256xf32>
    %42 = arith.subf %30, %41 : vector<1x256xf32>
    %43 = math.exp %42 : vector<1x256xf32>
    %c0_23 = arith.constant 0 : index
    %c0_24 = arith.constant 0 : index
    %c0_25 = arith.constant 0 : index
    %44 = vector.load %arg10[%c0_23, %c0_24, %c0_25] : memref<1x1x1xf32, #tpu.memory_space<vmem>>, vector<1x1x1xf32>
    %45 = vector.shape_cast %44 : vector<1x1x1xf32> to vector<1x1xf32>
    %46 = arith.mulf %40, %45 : vector<1x1xf32>
    %cst_26 = arith.constant dense<0.000000e+00> : vector<1xf32>
    %47 = vector.multi_reduction <add>, %43, %cst_26 [1] : vector<1x256xf32> to vector<1xf32>
    %48 = vector.shape_cast %47 : vector<1xf32> to vector<1x1xf32>
    %49 = arith.addf %46, %48 : vector<1x1xf32>
    %c0_27 = arith.constant 0 : index
    %c0_28 = arith.constant 0 : index
    %c0_29 = arith.constant 0 : index
    %50 = vector.load %arg10[%c0_27, %c0_28, %c0_29] : memref<1x1x1xf32, #tpu.memory_space<vmem>>, vector<1x1x1xf32>
    %51 = vector.shape_cast %50 : vector<1x1x1xf32> to vector<1x1xf32>
    %52 = vector.shape_cast %49 : vector<1x1xf32> to vector<1x1x1xf32>
    tpu.vector_store %arg10[%c0_27, %c0_28, %c0_29], %52 {strides = array<i32>} : memref<1x1x1xf32, #tpu.memory_space<vmem>>, vector<1x1x1xf32>,
    %c0_30 = arith.constant 0 : index
    %c0_31 = arith.constant 0 : index
    %c0_32 = arith.constant 0 : index
    %53 = vector.load %arg11[%c0_30, %c0_31, %c0_32] : memref<1x1x128xf32, #tpu.memory_space<vmem>>, vector<1x1x128xf32>
    %54 = vector.shape_cast %53 : vector<1x1x128xf32> to vector<1x128xf32>
    %55 = vector.broadcast %40 : vector<1x1xf32> to vector<1x128xf32>
    %56 = arith.mulf %55, %54 : vector<1x128xf32>
    %57 = arith.truncf %43 : vector<1x256xf32> to vector<1x256xbf16>
    %cst_33 = arith.constant dense<0.000000e+00> : vector<1x128xf32>
    %58 = tpu.matmul %57, %11, %cst_33 {dimension_numbers = #tpu.dot_dimension_numbers<[1], [0], [0], [1], [0, 0, 1, 1], [], []>} : vector<1x256xbf16>, vector<256x128xbf16>, vector<1x128xf32> -> vector<1x128xf32>
    %59 = arith.addf %56, %58 : vector<1x128xf32>
    %c0_34 = arith.constant 0 : index
    %c0_35 = arith.constant 0 : index
    %c0_36 = arith.constant 0 : index
    %60 = vector.load %arg11[%c0_34, %c0_35, %c0_36] : memref<1x1x128xf32, #tpu.memory_space<vmem>>, vector<1x1x128xf32>
    %61 = vector.shape_cast %60 : vector<1x1x128xf32> to vector<1x128xf32>
    %62 = vector.shape_cast %59 : vector<1x128xf32> to vector<1x1x128xf32>
    tpu.vector_store %arg11[%c0_34, %c0_35, %c0_36], %62 {strides = array<i32>} : memref<1x1x128xf32, #tpu.memory_space<vmem>>, vector<1x1x128xf32>,
    %c0_37 = arith.constant 0 : index
    %c0_38 = arith.constant 0 : index
    %c0_39 = arith.constant 0 : index
    %63 = vector.load %arg9[%c0_37, %c0_38, %c0_39] : memref<1x1x1xf32, #tpu.memory_space<vmem>>, vector<1x1x1xf32>
    %64 = vector.shape_cast %63 : vector<1x1x1xf32> to vector<1x1xf32>
    %65 = vector.shape_cast %38 : vector<1x1xf32> to vector<1x1x1xf32>
    tpu.vector_store %arg9[%c0_37, %c0_38, %c0_39], %65 {strides = array<i32>} : memref<1x1x1xf32, #tpu.memory_space<vmem>>, vector<1x1x1xf32>,
    return
  }
  func.func @transform_0(%arg0: i32, %arg1: i32) -> (i32, i32) {
    %c2_i32 = arith.constant 2 : i32
    %0 = arith.muli %arg0, %c2_i32 : i32
    %1 = arith.addi %0, %arg1 : i32
    %c0_i32 = arith.constant 0 : i32
    %c0_i32_0 = arith.constant 0 : i32
    return %1, %c0_i32 : i32, i32
  }
  func.func @transform_1(%arg0: i32, %arg1: i32) -> (i32, i32) {
    %c0_i32 = arith.constant 0 : i32
    %c0_i32_0 = arith.constant 0 : i32
    %c0_i32_1 = arith.constant 0 : i32
    return %c0_i32, %c0_i32_0 : i32, i32
  }
  func.func @transform_2(%arg0: i32, %arg1: i32) -> (i32, i32) {
    %c0_i32 = arith.constant 0 : i32
    %c0_i32_0 = arith.constant 0 : i32
    %c0_i32_1 = arith.constant 0 : i32
    return %c0_i32, %c0_i32_0 : i32, i32
  }
  func.func @transform_3(%arg0: i32, %arg1: i32) -> (i32, i32) {
    %c0_i32 = arith.constant 0 : i32
    %c0_i32_0 = arith.constant 0 : i32
    %c0_i32_1 = arith.constant 0 : i32
    return %c0_i32, %c0_i32_0 : i32, i32
  }
  func.func @transform_4(%arg0: i32, %arg1: i32) -> (i32, i32) {
    %c0_i32 = arith.constant 0 : i32
    %c0_i32_0 = arith.constant 0 : i32
    %c0_i32_1 = arith.constant 0 : i32
    return %c0_i32, %c0_i32_0 : i32, i32
  }
  func.func @transform_5(%arg0: i32, %arg1: i32) -> (i32, i32) {
    %c0_i32 = arith.constant 0 : i32
    %c0_i32_0 = arith.constant 0 : i32
    %c0_i32_1 = arith.constant 0 : i32
    return %c0_i32, %c0_i32_0 : i32, i32
  }
  func.func @transform_6(%arg0: i32, %arg1: i32) -> (i32, i32, i32) {
    %c2_i32 = arith.constant 2 : i32
    %0 = arith.muli %arg0, %c2_i32 : i32
    %1 = arith.addi %0, %arg1 : i32
    %c0_i32 = arith.constant 0 : i32
    %c0_i32_0 = arith.constant 0 : i32
    %c0_i32_1 = arith.constant 0 : i32
    return %1, %c0_i32, %c0_i32_0 : i32, i32, i32
  }
  func.func @transform_7(%arg0: i32, %arg1: i32) -> (i32, i32, i32) {
    %c0_i32 = arith.constant 0 : i32
    %c0_i32_0 = arith.constant 0 : i32
    %c0_i32_1 = arith.constant 0 : i32
    return %arg0, %c0_i32, %c0_i32_0 : i32, i32, i32
  }
  func.func @transform_8(%arg0: i32, %arg1: i32) -> (i32, i32, i32) {
    %c0_i32 = arith.constant 0 : i32
    %c0_i32_0 = arith.constant 0 : i32
    %c0_i32_1 = arith.constant 0 : i32
    return %arg0, %c0_i32, %c0_i32_0 : i32, i32, i32
  }
  func.func @transform_9(%arg0: i32, %arg1: i32) -> (i32, i32, i32) {
    %c0_i32 = arith.constant 0 : i32
    %c0_i32_0 = arith.constant 0 : i32
    %c0_i32_1 = arith.constant 0 : i32
    return %arg0, %c0_i32, %c0_i32_0 : i32, i32, i32
  }
}

</mosaic_0001>

<bundles_post_ra>
// kernel: tpu_custom_call.1
= control target key start
LH: loop header
LB: loop body
LE: loop exit
PB: predicated region body
PF: predicated region fallthrough
CT: control target
= control target key end

     0   :  { %s3193_s0 = inlined_call_operand.hbm [shape: bf16[1024,256], index: 0, kind: input, shape index: {}]   ;;  %s3194_s1 = inlined_call_operand.hbm [shape: bf16[256,128], index: 1, kind: input, shape index: {}]   ;;  %s3195_s2 = inlined_call_operand.vmem [shape: f32[1,128], index: 2, kind: input, shape index: {}]   ;;  %s3196_s3 = inlined_call_operand.hbm [shape: bf16[128,128], index: 3, kind: input, shape index: {}]   ;;  %s3197_s4 = inlined_call_operand.vmem [shape: f32[1,128], index: 4, kind: input, shape index: {}]   ;;  %s3198_s5 = inlined_call_operand.vmem [shape: bf16[1,128], index: 5, kind: input, shape index: {}]   ;;  %s3199_s6 = inlined_call_operand.hbm [shape: f32[4,1,256], index: 6, kind: output, shape index: {0}]   ;;  %s3200_s7 = inlined_call_operand.vmem [shape: f32[2,1,1], index: 7, kind: output, shape index: {1}]   ;;  %s3201_s8 = inlined_call_operand.vmem [shape: f32[2,1,1], index: 8, kind: output, shape index: {2}]   ;;  %s3202_s9 = inlined_call_operand.hbm [shape: f32[2,1,128], index: 9, kind: output, shape index: {3}]  }
   0x1   :  { %3221 = sst [smem:[#allocation23_spill]] %s3193_s0 }
   0x2   :  { %3222 = sst [smem:[#allocation24_spill]] %s3194_s1 }
   0x3   :  { %3223 = sst [smem:[#allocation25_spill]] %s3195_s2 }
   0x4   :  { %3224 = sst [smem:[#allocation26_spill]] %s3196_s3 }
   0x5   :  { %3225 = sst [smem:[#allocation27_spill]] %s3197_s4 }
   0x6   :  { %3226 = sst [smem:[#allocation28_spill]] %s3198_s5 }
   0x7   :  { %3227 = sst [smem:[#allocation29_spill]] %s3199_s6 }
   0x8   :  { %3228 = sst [smem:[#allocation30_spill]] %s3202_s9 }
   0x9   :  { %15 = vsyncpa [#allocation3], 0 }
   0xa   :  { %17 = vsyncpa [#allocation3 + $0x1], 0 }
   0xb   :  { %18 = vsyncpa [#allocation6], 0 }
   0xc   :  { %19 = vsyncpa [#allocation4], 0 }
   0xd   :  { %21 = vsyncpa [#allocation4 + $0x1], 0 }
   0xe   :  { %22 = vsyncpa [#allocation10], 0 }
   0xf   :  { %24 = vsyncpa [#allocation10 + $0x1], 0  ;;  %s2549_s30 = smov 0   ;;  %s2551_s10 = smov 0  }
  0x10   :  { %s2553_s11 = smov 0   ;;  %s2555_s12 = smov 0  }
  0x11   :  { %s2557_s13 = smov 0   ;;  %s2559_s14 = smov 0  }
  0x12   :  { %s2561_s15 = smov 0   ;;  %s2563_s16 = smov 0  }
  0x13   :  { %s2565_s17 = smov 0   ;;  %s2567_s18 = smov 0  }
  0x14   :  { %s2569_s19 = smov 0  }
  0x15 LB: > { %3229 = sst [smem:[#allocation15_spill]] %s2444_s30  ;;  %s1645_s20 = sadd.s32 4294967295, %s2484_s19   ;;  %s2484_s19 = sphi %s2569_s19, %s30_s19   ;;  %s2480_s18 = sphi %s2567_s18, %s3285_s18   ;;  %s2476_s17 = sphi %s2565_s17, %s3284_s17   ;;  %s2472_s16 = sphi %s2563_s16, %s3283_s16   ;;  %s2468_s15 = sphi %s2561_s15, %s3282_s15   ;;  %s2464_s14 = sphi %s2559_s14, %s3281_s14   ;;  %s2460_s13 = sphi %s2557_s13, %s3280_s13   ;;  %s2456_s12 = sphi %s2555_s12, %s3279_s12   ;;  %s2452_s11 = sphi %s2553_s11, %s3278_s11   ;;  %s2448_s10 = sphi %s2551_s10, %s3277_s10   ;;  %s2444_s30 = sphi %s2549_s30, %s3276_s30  }
  0x16   : > { %3230 = sst [smem:[#allocation16_spill]] %s2456_s12  ;;  %s1646_s21 = sadd.s32 4294967294, %s2484_s19  }
  0x17   : > { %3231 = sst [smem:[#allocation17_spill]] %s2468_s15  ;;  %p66_p0 = scmp.ne.s32.totalorder %s2460_s13, %s2456_s12 }
  0x18   : > { %3232 = sst [smem:[#allocation18_spill]] %s2476_s17  ;;  %p2608_p1 = scmp.eq.s32.totalorder %s1645_s20, 0 }
  0x19   : > { %p2612_p2 = scmp.eq.s32.totalorder %s1645_s20, 3  ;;  %p205_p3 = scmp.eq.s32.totalorder %s1646_s21, 3 }
  0x1a   : > { %s3233_s22 = scalar_select %p2608_p1, 1, 0 }
  0x1b   : > { %s3234_s23 = scalar_select %p2612_p2, 1, 0 }
  0x1c   : > { %p2618_p4 = por %p2608_p1, %p66_p0  ;;  %p2623_p5 = por %p205_p3, %p66_p0 }
  0x1d   : > { %p276_p6 = scmp.ne.s32.totalorder %s2452_s11, %s2448_s10  ;;  %p282_p7 = scmp.ne.s32.totalorder %s2448_s10, %s2444_s30 }
  0x1e   : > { %s3235_s24 = scalar_select %p2618_p4, 1, 0 }
  0x1f   : > { %s3236_s26 = scalar_select %p2623_p5, 1, 0 }
  0x20   : > { %p1651_p8 = scmp.ge.s32.totalorder %s2484_s19, 1  ;;  %p2634_p9 = por %p276_p6, %p2612_p2 }
  0x21   : > { %3237 = sst [smem:[#allocation19_spill]] %s3236_s26  ;;  %p290_p10 = scmp.lt.s32.totalorder %s2484_s19, 5 }
  0x22   : > { %s3238_s27 = scalar_select %p2634_p9, 1, 0 }
  0x23   : > { %p2639_p11 = por %p282_p7, %p205_p3  ;;  %p2643_p12 = pnand %p1651_p8, %p290_p10 }
  0x24   : > { %3239 = sst [smem:[#allocation20_spill]] %s3238_s27  ;;  %s2486_s20 = smov [#allocation5]  }
  0x25   : > { %s3240_s28 = scalar_select %p2639_p11, 1, 0 }
  0x26   : > { %s3242_s29 = scalar_select %p2643_p12, 1, 0 }
  0x27   : > { %3241 = sst [smem:[#allocation21_spill]] %s3240_s28  ;;  %s302_s21 = sshll.u32 %s2486_s20, 4  ;;  %s303_s21 = int_to_ptr.vmem [resolvable:$true] %s302_s21 }
  0x28   : > { %p1974_p13 = pneg %p2643_p12  ;;  %s2487_s30 = smov [#allocation7]  }
  0x29   : > { %s318_s26 = sshll.u32 %s2487_s30, 4  ;;  %s3244_s1 = sld [smem:[#allocation24_spill]]  ;;  %s2655_s26 = int_to_ptr.vmem [resolvable:$true] %s318_s26 }
  0x2a   : > { %p2651_p0 = pnand %p1974_p13, %p2608_p1 }
  0x2c   : > { %p2242_p6 = pneg %p2651_p0 }
  0x2f   : > { %s2240_s9 = scalar_lea.hbm %s3244_s1, 2048 }
  0x30   : > { %p2241_p3 = scmp.ne.s32.totalorder %s3244_s1, %s2240_s9  ;;  %p2247_p10 = scmp.lt.u32.totalorder %s2240_s9, %s3244_s1 }
  0x32   : > { %p2243_p7 = pnand %p2242_p6, %p2241_p3 }
  0x34   : > { %p2244_p8 = pneg %p2243_p7 }
  0x36   : > { %p2249_p13 = pnand %p2247_p10, %p2244_p8 }
  0x38   : > { %2252 = shalt.err (!%p2249_p13)
}
  0x39   : > { %s2253_s30 = scalar_lea.vmem %s303_s21, 2048  ;;  %p2261_p1 = scmp.lt.s32.totalorder %s303_s21, %s303_s21 }
  0x3a   : > { %p2254_p11 = scmp.ne.s32.totalorder %s303_s21, %s2253_s30  ;;  %p2262_p4 = scmp.lt.s32.totalorder %s2253_s30, %s2253_s30 }
  0x3c   : > { %p2256_p5 = pnand %p2254_p11, %p2242_p6  ;;  %p2263_p12 = por %p2262_p4, %p2261_p1 }
  0x3e   : > { %p2257_p9 = pneg %p2256_p5 }
  0x40   : > { %p2264_p2 = pnand %p2263_p12, %p2257_p9 }
  0x42   : > { %2267 = shalt.err (!%p2264_p2)
}
  0x43   : > { %s2488_s12 = smov 64   ;;  %s2489_s27 = smov 4  }
  0x44   : > { %1977 = dma.hbm_to_vmem [thread:$0]  (!%p2651_p0), %s3244_s1, 2048, %s303_s21, [#allocation6], %s2488_s12, %s2488_s12, %s2489_s27  }
  0x45   : > { %s3245_s3 = sld [smem:[#allocation26_spill]] }
  0x4b   : > { %s2268_s20 = scalar_lea.hbm %s3245_s3, 1024 }
  0x4c   : > { %p2269_p5 = scmp.ne.s32.totalorder %s3245_s3, %s2268_s20  ;;  %p2275_p4 = scmp.lt.u32.totalorder %s2268_s20, %s3245_s3 }
  0x4e   : > { %p2271_p1 = pnand %p2269_p5, %p2242_p6 }
  0x50   : > { %p2272_p2 = pneg %p2271_p1 }
  0x52   : > { %p2277_p9 = pnand %p2275_p4, %p2272_p2 }
  0x54   : > { %2280 = shalt.err (!%p2277_p9)
}
  0x55   : > { %s2281_s21 = scalar_lea.vmem %s2655_s26, 1024  ;;  %p2289_p7 = scmp.lt.s32.totalorder %s2655_s26, %s2655_s26 }
  0x56   : > { %p2282_p11 = scmp.ne.s32.totalorder %s2655_s26, %s2281_s21  ;;  %p2290_p8 = scmp.lt.s32.totalorder %s2281_s21, %s2281_s21 }
  0x58   : > { %p2284_p12 = pnand %p2282_p11, %p2242_p6  ;;  %p2291_p10 = por %p2290_p8, %p2289_p7 }
  0x5a   : > { %p2285_p3 = pneg %p2284_p12 }
  0x5c   : > { %p2292_p13 = pnand %p2291_p10, %p2285_p3 }
  0x5e   : > { %2295 = shalt.err (!%p2292_p13)
}
  0x5f   : > { %1980 = dma.hbm_to_vmem [thread:$0]  (!%p2651_p0), %s3245_s3, 1024, %s2655_s26, [#allocation6], %s2488_s12, %s2488_s12, %s2489_s27  }
  0x60   : > { %s39_s15 = sadd.s32 1, %s2476_s17  ;;  %s42_s25 = sadd.s32 1, %s2480_s18 }
  0x61   : > { %p40_p6 = scmp.ge.s32.totalorder %s39_s15, 2  ;;  %s1647_s5 = sshll.u32 %s2480_s18, 1 }
  0x62   : > { %s53_s6 = sadd.s32 1, %s2464_s14  ;;  %s47_s9 = sadd.s32 %s2476_s17, %s1647_s5 }
  0x63   : > { %s3287_s15 = smov (%p40_p6, %s39_s15), 0  ;;  %s3289_s25 = smov (!%p40_p6, %s42_s25), %s2480_s18 }
  0x64   : > { %p60_p5 = scmp.ne.s32.totalorder %s2464_s14, %s2460_s13  ;;  %p44_p1 = scmp.ge.s32.totalorder %s3289_s25, 2 }
  0x65   : > { %p61_p2 = scmp.eq.s32.totalorder %s2484_s19, 0  ;;  %p3246_p4 = scmp.ne.s32.totalorder %s3234_s23, 0 }
  0x66   : > { %p1994_p9 = scmp.lt.s32.totalorder %s2484_s19, 4  ;;  %s3291_s25 = smov (%p44_p1, %s3289_s25), 0 }
  0x67   : > { %p2717_p0 = por %p3246_p4, %p60_p5  ;;  %p2724_p11 = por %p61_p2, %p60_p5 }
  0x68   : > { %s338_s27 = sand.u32 1, %s2464_s14   ;;  %s1648_s28 = sshll.u32 %s3291_s25, 1 }
  0x69   : > { %s3247_s26 = scalar_select %p2717_p0, 1, 0 }
  0x6a   : > { %s263_s20 = ssub.s32 %s2480_s18, %s3291_s25  ;;  %s49_s30 = sadd.s32 %s1648_s28, %s3287_s15 }
  0x6b   : > { %3248 = sst [smem:[#allocation22_spill]] %s3247_s26  ;;  %p264_p12 = scmp.eq.s32.totalorder %s263_s20, 0 }
  0x6c   : > { %s50_s23 = ssub.s32 %s47_s9, %s49_s30  ;;  %s1655_s21 = sshll.u32 %s338_s27, 8 }
  0x6d   : > { %p51_p3 = scmp.eq.s32.totalorder %s50_s23, 0  ;;  %s3250_s2 = sadd.s32 1, %s2452_s11 }
  0x6e   : > { %s2736_s4 = scalar_select %p264_p12, %s2452_s11, %s3250_s2  }
  0x6f   : > { %s2739_s5 = scalar_select %p51_p3, %s2464_s14, %s53_s6  }
  0x70   : > { %s1734_s1 = sshll.u32 %s47_s9, 12  ;;  %s3251_s0 = sld [smem:[#allocation23_spill]] }
  0x71   : > { %s342_s28 = scalar_lea.vmem [#allocation2], %s1655_s21  ;;  %p2752_p7 = pnand %p1994_p9, %p2724_p11 }
  0x72   : > { %s352_s20 = sshll.u32 %s342_s28, 4  ;;  %s2756_s6 = scalar_lea.sflag [#allocation3], %s338_s27  ;;  %s2746_s20 = int_to_ptr.vmem [resolvable:$true] %s352_s20 }
  0x73   : > { %p2298_p10 = pneg %p2752_p7 }
  0x76   : > { %s2744_s26 = scalar_lea.hbm %s3251_s0, %s1734_s1  ;;  %s2301_s9 = scalar_lea.hbm %s3251_s0, 16384 }
  0x77   : > { %s2296_s1 = scalar_lea.hbm %s2744_s26, 4096  ;;  %p2302_p5 = scmp.lt.u32.totalorder %s2744_s26, %s3251_s0 }
  0x78   : > { %p2297_p8 = scmp.ne.s32.totalorder %s2744_s26, %s2296_s1  ;;  %p2303_p1 = scmp.lt.u32.totalorder %s2301_s9, %s2296_s1 }
  0x79   : > { %p2305_p4 = scmp.lt.u32.totalorder %s2296_s1, %s2744_s26 }
  0x7a   : > { %p2299_p13 = pnand %p2298_p10, %p2297_p8  ;;  %p2304_p2 = por %p2303_p1, %p2302_p5 }
  0x7c   : > { %p2300_p6 = pneg %p2299_p13  ;;  %p2306_p9 = por %p2305_p4, %p2304_p2 }
  0x7e   : > { %p2307_p11 = pnand %p2306_p9, %p2300_p6 }
  0x80   : > { %2310 = shalt.err (!%p2307_p11)
}
  0x81   : > { %s2311_s27 = scalar_lea.vmem %s2746_s20, 4096  ;;  %s2490_s21 = smov [#allocation2]  }
  0x82   : > { %p2312_p12 = scmp.ne.s32.totalorder %s2746_s20, %s2311_s27  ;;  %s2316_s2 = sshll.u32 %s2490_s21, 4  ;;  %s2317_s2 = int_to_ptr.vmem [resolvable:$false] %s2316_s2 }
  0x83   : > { %s2318_s28 = scalar_lea.vmem %s2317_s2, 8192  ;;  %p2319_p13 = scmp.lt.s32.totalorder %s2746_s20, %s2317_s2 }
  0x84   : > { %p2314_p3 = pnand %p2312_p12, %p2298_p10  ;;  %p2320_p5 = scmp.lt.s32.totalorder %s2318_s28, %s2311_s27 }
  0x86   : > { %p2315_p8 = pneg %p2314_p3  ;;  %p2321_p1 = por %p2320_p5, %p2319_p13 }
  0x88   : > { %p2322_p2 = pnand %p2321_p1, %p2315_p8 }
  0x8a   : > { %2325 = shalt.err (!%p2322_p2)
}
  0x8b   : > { %s2491_s1 = smov 128   ;;  %s2492_s3 = smov 8  }
  0x8c   : > { %1984 = dma.hbm_to_vmem [thread:$0]  (!%p2752_p7), %s2744_s26, 4096, %s2746_s20, %s2756_s6, %s2491_s1, %s2491_s1, %s2492_s3  }
  0x8d   : > { %p3253_p10 = scmp.ne.s32.totalorder %s3242_s29, 0 }
  0x8e   : > { %s2787_s17 = sand.u32 (!%p3253_p10), 1, %s2460_s13   ;;  %p3254_p6 = scmp.ne.s32.totalorder (!%p3253_p10), %s3235_s24, 0 }
  0x8f   : > { %364 = sbr.rel (%p3253_p10) target bundleno = 1534 (0x5fe), region = 44  ;;  %s1661_s9 = sshll.u32 (!%p3253_p10), %s2787_s17, 8 }
  0x90   : > { %s367_s12 = scalar_lea.sflag (!%p3253_p10), [#allocation3], %s2787_s17  ;;  %s2791_s23 = scalar_lea.vmem (!%p3253_p10), [#allocation2], %s1661_s9 }
  0x96   : > { %2427 = dma.done.wait (%p3254_p6), %s367_s12, 4096  }
  0x97   : > { %2429 = vsyncadd (%p3254_p6), %s367_s12, 4294963200  ;;  %p3255_p7 = scmp.ne.s32.totalorder %s3233_s22, 0 }
  0x99   : > { %2431 = dma.done.wait (%p3255_p7), [#allocation6], 3072  }
  0x9a   : > { %2433 = vsyncadd (%p3255_p7), [#allocation6], 4294964224  ;;  %s1664_s29 = sshll.u32 %s2787_s17, 1  ;;  %s3220_s26 = sand.u32 1, %s2448_s10  }
  0x9b   : > { %p428_p4 = scmp.lt.s32.totalorder %s2472_s16, 1  ;;  %s2815_s22 = scalar_lea.vmem [#allocation8], %s1664_s29 }
  0x9c   : > { %s2819_s28 = scalar_lea.vmem [#allocation9], %s3220_s26  ;;  %s3256_s1 = sld [smem:[#allocation17_spill]] }
  0x9d   : > { %s429_s20 = scalar_select %p428_p4, %s2472_s16, 1 }
  0x9f   : > { %s2808_s24 = scalar_lea.vmem %s3200_s7, %s429_s20  ;;  %s2813_s2 = scalar_lea.vmem %s3201_s8, %s429_s20 }
  0xa2   : > { %p1665_p9 = scmp.ne.s32.totalorder %s3256_s1, 0 }
  0xa3   : > { %vm439_vm0 = vcmask (!%p1665_p9), 0   ;;  %v2493_v0 = vmov (!%p1665_p9), -inf   ;;  %v2494_v1 = vmov (!%p1665_p9), 0.0  }
  0xa4   : > { %438 = sbr.rel (%p1665_p9) target bundleno = 171 (0xab), region = 60  ;;  %440 = vst.msk [vmem:[%s2808_s24] sm:$0x1] (!%p1665_p9), %vm439_vm0, %v2493_v0  ;;  %441 = vst.msk [vmem:[%s2813_s2] sm:$0x1] (!%p1665_p9), %vm439_vm0, %v2494_v1 }
  0xa5   : > { %442 = vst [vmem:[%s2819_s28] sm:$0x1] (!%p1665_p9), %v2494_v1 }
  0xab PF: > { %v2098_v2 = vld [vmem:[#allocation5 + $0x40] sm:$0xff]   ;;  %v2100_v4 = vld [vmem:[#allocation5 + $0x48] sm:$0xff]   ;;  %v2102_v6 = vld [vmem:[#allocation5 + $0x50] sm:$0xff]   ;;  %s3257_s12 = sld [smem:[#allocation25_spill]]  ;;  %s3258_s20 = sld [smem:[#allocation27_spill]]  ;;  %vm1338_vm3 = vcmask 1040384  }
  0xac   : > { %v2099_v3 = vld [vmem:[#allocation5] sm:$0xff]   ;;  %1736 = vmatprep.subr.bf16.mxu0 %v2098_v2  ;;  %v2101_v5 = vld [vmem:[#allocation5 + $0x8] sm:$0xff]   ;;  %v2103_v7 = vld [vmem:[#allocation5 + $0x10] sm:$0xff]   ;;  %s3259_s27 = sld [smem:[#allocation28_spill]]  ;;  %s3260_s21 = sld [smem:[#allocation17_spill]]  ;;  %vm1371_vm5 = vcmask 0  }
  0xad   : > { %1737 = vmatpush3.bf16.msra.mxu0 %v2099_v3  ;;  %v2104_v8 = vld [vmem:[#allocation5 + $0x58] sm:$0xff]   ;;  %v2106_v10 = vld [vmem:[#allocation5 + $0x60] sm:$0xff]   ;;  %v2108_v12 = vld [vmem:[#allocation5 + $0x68] sm:$0xff]   ;;  %s1724_s1 = sshll.u32 %s2472_s16, 1  ;;  %s3262_s30 = sld [smem:[#allocation29_spill]] }
  0xae   : > { %1738 = vmatprep.subr.bf16.mxu0 %v2100_v4  ;;  %v2105_v9 = vld [vmem:[#allocation5 + $0x18] sm:$0xff]   ;;  %v2107_v11 = vld [vmem:[#allocation5 + $0x20] sm:$0xff]   ;;  %v2109_v14 = vld [vmem:[#allocation5 + $0x28] sm:$0xff]  }
  0xaf   : > { %v2116_v13 = vld [vmem:[%s2791_s23 + $0x4] ss:$8 sps:$4 sm:$0xff]   ;;  %v2110_v15 = vld [vmem:[#allocation5 + $0x70] sm:$0xff]   ;;  %v2112_v17 = vld [vmem:[#allocation5 + $0x78] sm:$0xff]  }
  0xb0   : > { %802 = vmatprep.mubr.bf16.mxu0 %v2116_v13  ;;  %v2111_v16 = vld [vmem:[#allocation5 + $0x30] sm:$0xff]   ;;  %v2113_v18 = vld [vmem:[#allocation5 + $0x38] sm:$0xff]   ;;  %v2114_v19 = vld [vmem:[%s2791_s23] ss:$8 sps:$4 sm:$0xff]  }
  0xb1   : > { %1739 = vmatpush3.bf16.msra.mxu0 %v2101_v5  ;;  %v2117_v20 = vld [vmem:[%s2791_s23 + $0x14] ss:$8 sps:$4 sm:$0xff]   ;;  %v2119_v21 = vld [vmem:[%s2791_s23 + $0x10] ss:$8 sps:$4 sm:$0xff]   ;;  %v2120_v22 = vld [vmem:[%s2791_s23 + $0x24] ss:$8 sps:$4 sm:$0xff]  }
  0xb2   : > { %1740 = vmatprep.subr.bf16.mxu0 %v2102_v6  ;;  %v2162_v23 = vld [vmem:[#allocation7] sm:$0xff]   ;;  %v2163_v24 = vld [vmem:[#allocation7 + $0x8] sm:$0xff]   ;;  %v2164_v25 = vld [vmem:[#allocation7 + $0x10] sm:$0xff]   ;;  %s3076_s3 = sadd.s32 %s3260_s21, %s1724_s1  ;;  %s1430_s21 = scalar_lea.sflag [#allocation4], %s2787_s17 }
  0xb3   : > { %1912 = vmatprep.subr.bf16.mxu1 %v2162_v23  ;;  %v2122_v26 = vld [vmem:[%s2791_s23 + $0x20] ss:$8 sps:$4 sm:$0xff]   ;;  %v2123_v27 = vld [vmem:[%s2791_s23 + $0x34] ss:$8 sps:$4 sm:$0xff]   ;;  %v2125_v28 = vld [vmem:[%s2791_s23 + $0x30] ss:$8 sps:$4 sm:$0xff]   ;;  %s3263_s6 = smov %s3262_s30 }
  0xb4   : > { %1913 = vmatpush3.bf16.msra.mxu1 %v2162_v23  ;;  %v2126_v29 = vld [vmem:[%s2791_s23 + $0x44] ss:$8 sps:$4 sm:$0xff]   ;;  %v2128_v30 = vld [vmem:[%s2791_s23 + $0x40] ss:$8 sps:$4 sm:$0xff]   ;;  %v2129_v31 = vld [vmem:[%s2791_s23 + $0x54] ss:$8 sps:$4 sm:$0xff]  }
  0xb5   : > { %1741 = vmatpush3.bf16.msra.mxu0 %v2103_v7  ;;  %1914 = vmatprep.subr.bf16.mxu1 %v2163_v24  ;;  %v2131_v32 = vld [vmem:[%s2791_s23 + $0x50] ss:$8 sps:$4 sm:$0xff]   ;;  %v2132_v33 = vld [vmem:[%s2791_s23 + $0x64] ss:$8 sps:$4 sm:$0xff]   ;;  %v2134_v34 = vld [vmem:[%s2791_s23 + $0x60] ss:$8 sps:$4 sm:$0xff]  }
  0xb6   : > { %1742 = vmatprep.subr.bf16.mxu0 %v2104_v8  ;;  %v2135_v35 = vld [vmem:[%s2791_s23 + $0x74] ss:$8 sps:$4 sm:$0xff]   ;;  %v2137_v36 = vld [vmem:[%s2791_s23 + $0x70] ss:$8 sps:$4 sm:$0xff]   ;;  %v2138_v37 = vld [vmem:[%s2791_s23 + $0x84] ss:$8 sps:$4 sm:$0xff]  }
  0xb7   : > { %v2140_v38 = vld [vmem:[%s2791_s23 + $0x80] ss:$8 sps:$4 sm:$0xff]   ;;  %v2141_v39 = vld [vmem:[%s2791_s23 + $0x94] ss:$8 sps:$4 sm:$0xff]   ;;  %v2143_v40 = vld [vmem:[%s2791_s23 + $0x90] ss:$8 sps:$4 sm:$0xff]  }
  0xb8   : > { %1915 = vmatpush3.bf16.msra.mxu1 %v2163_v24  ;;  %v2144_v41 = vld [vmem:[%s2791_s23 + $0xa4] ss:$8 sps:$4 sm:$0xff]   ;;  %v2146_v42 = vld [vmem:[%s2791_s23 + $0xa0] ss:$8 sps:$4 sm:$0xff]   ;;  %v2147_v43 = vld [vmem:[%s2791_s23 + $0xb4] ss:$8 sps:$4 sm:$0xff]  }
  0xb9   : > { %1743 = vmatpush3.bf16.msra.mxu0 %v2105_v9  ;;  %1916 = vmatprep.subr.bf16.mxu1 %v2164_v25  ;;  %v2165_v44 = vld [vmem:[#allocation7 + $0x18] sm:$0xff]   ;;  %v2150_v46 = vld [vmem:[%s2791_s23 + $0xc4] ss:$8 sps:$4 sm:$0xff]   ;;  %v2152_v49 = vld [vmem:[%s2791_s23 + $0xc0] ss:$8 sps:$4 sm:$0xff]   ;;  %s1725_s9 = sshll.u32 %s3076_s3, 8 }
  0xba   : > { %1744 = vmatprep.subr.bf16.mxu0 %v2106_v10  ;;  %v2149_v45 = vld [vmem:[%s2791_s23 + $0xb0] ss:$8 sps:$4 sm:$0xff]   ;;  %v2166_v47 = vld [vmem:[#allocation7 + $0x20] sm:$0xff]   ;;  %v2167_v48 = vld [vmem:[#allocation7 + $0x28] sm:$0xff]  }
  0xbb   : > { %v2153_v50 = vld [vmem:[%s2791_s23 + $0xd4] ss:$8 sps:$4 sm:$0xff]   ;;  %v2155_v53 = vld [vmem:[%s2791_s23 + $0xd0] ss:$8 sps:$4 sm:$0xff]   ;;  %v2156_v54 = vld [vmem:[%s2791_s23 + $0xe4] ss:$8 sps:$4 sm:$0xff]  }
  0xbc   : > { %1917 = vmatpush3.bf16.msra.mxu1 %v2164_v25  ;;  %v2168_v51 = vld [vmem:[#allocation7 + $0x30] sm:$0xff]   ;;  %v2169_v52 = vld [vmem:[#allocation7 + $0x38] sm:$0xff]   ;;  %v2158_v55 = vld [vmem:[%s2791_s23 + $0xe0] ss:$8 sps:$4 sm:$0xff]  }
  0xbd   : > { %1745 = vmatpush3.bf16.msra.mxu0 %v2107_v11  ;;  %1918 = vmatprep.subr.bf16.mxu1 %v2165_v44  ;;  %v2159_v56 = vld [vmem:[%s2791_s23 + $0xf4] ss:$8 sps:$4 sm:$0xff]   ;;  %v2161_v57 = vld [vmem:[%s2791_s23 + $0xf0] ss:$8 sps:$4 sm:$0xff]   ;;  %v2860_v59 = vld [vmem:[%s3257_s12] ss:$0 sm:$0xff] }
  0xbe   : > { %1746 = vmatprep.subr.bf16.mxu0 %v2108_v12  ;;  %s1735_s12 = sshll.u32 %s3076_s3, 5  ;;  %s1456_s23 = sshll.u32 %s2815_s22, 4  ;;  %s1457_s23 = int_to_ptr.vmem [resolvable:$true] %s1456_s23 }
  0xbf   : > { %s2326_s1 = scalar_lea.vmem %s1457_s23, 32 }
  0xc0   : > { %1919 = vmatpush3.bf16.msra.mxu1 %v2165_v44  ;;  %p2327_p11 = scmp.ne.s32.totalorder %s1457_s23, %s2326_s1 }
  0xc1   : > { %1747 = vmatpush3.bf16.msra.mxu0 %v2109_v14  ;;  %1920 = vmatprep.subr.bf16.mxu1 %v2166_v47 }
  0xc2   : > { %1748 = vmatprep.subr.bf16.mxu0 %v2110_v15  ;;  %p2328_p12 = pnand %p2327_p11, %p2717_p0 }
  0xc4   : > { %1921 = vmatpush3.bf16.msra.mxu1 %v2166_v47  ;;  %p2329_p3 = pneg %p2328_p12 }
  0xc5   : > { %1749 = vmatpush3.bf16.msra.mxu0 %v2111_v16  ;;  %1922 = vmatprep.subr.bf16.mxu1 %v2167_v48 }
  0xc6   : > { %1750 = vmatprep.subr.bf16.mxu0 %v2112_v17 }
  0xc8   : > { %1923 = vmatpush3.bf16.msra.mxu1 %v2167_v48 }
  0xc9   : > { %1751 = vmatpush3.bf16.msra.mxu0 %v2113_v18  ;;  %1924 = vmatprep.subr.bf16.mxu1 %v2168_v51 }
  0xcc   : > { %803 = vmatmul.mubr.bf16.vlgmr.msra.gmra.mrb[0].mxu0 %v2114_v19  ;;  %1925 = vmatpush3.bf16.msra.mxu1 %v2168_v51 }
  0xcd   : > { %810 = vmatprep.mubr.bf16.mxu0 %v2117_v20  ;;  %1926 = vmatprep.subr.bf16.mxu1 %v2169_v52 }
  0xd0   : > { %1927 = vmatpush3.bf16.msra.mxu1 %v2169_v52 }
  0xd4   : > { %811 = vmatmul.mubr.bf16.gmra.mrb[4].mxu0 %v2119_v21 }
  0xd5   : > { %818 = vmatprep.mubr.bf16.mxu0 %v2120_v22 }
  0xdc   : > { %819 = vmatmul.mubr.bf16.gmra.mrb[8].mxu0 %v2122_v26 }
  0xdd   : > { %826 = vmatprep.mubr.bf16.mxu0 %v2123_v27 }
  0xe4   : > { %827 = vmatmul.mubr.bf16.gmra.mrb[12].mxu0 %v2125_v28 }
  0xe5   : > { %834 = vmatprep.mubr.bf16.mxu0 %v2126_v29 }
  0xec   : > { %835 = vmatmul.mubr.bf16.gmra.mrb[16].mxu0 %v2128_v30 }
  0xed   : > { %842 = vmatprep.mubr.bf16.mxu0 %v2129_v31 }
  0xf4   : > { %843 = vmatmul.mubr.bf16.gmra.mrb[20].mxu0 %v2131_v32 }
  0xf5   : > { %850 = vmatprep.mubr.bf16.mxu0 %v2132_v33 }
  0xfc   : > { %851 = vmatmul.mubr.bf16.gmra.mrb[24].mxu0 %v2134_v34 }
  0xfd   : > { %858 = vmatprep.mubr.bf16.mxu0 %v2135_v35 }
 0x104   : > { %859 = vmatmul.mubr.bf16.gmra.mrb[28].mxu0 %v2137_v36 }
 0x105   : > { %866 = vmatprep.mubr.bf16.mxu0 %v2138_v37 }
 0x10c   : > { %867 = vmatmul.mubr.bf16.gmra.mrb[32].mxu0 %v2140_v38 }
 0x10d   : > { %874 = vmatprep.mubr.bf16.mxu0 %v2141_v39 }
 0x114   : > { %875 = vmatmul.mubr.bf16.gmra.mrb[36].mxu0 %v2143_v40 }
 0x115   : > { %882 = vmatprep.mubr.bf16.mxu0 %v2144_v41 }
 0x11c   : > { %883 = vmatmul.mubr.bf16.gmra.mrb[40].mxu0 %v2146_v42 }
 0x11d   : > { %890 = vmatprep.mubr.bf16.mxu0 %v2147_v43 }
 0x124   : > { %891 = vmatmul.mubr.bf16.gmra.mrb[44].mxu0 %v2149_v45 }
 0x125   : > { %898 = vmatprep.mubr.bf16.mxu0 %v2150_v46 }
 0x12c   : > { %899 = vmatmul.mubr.bf16.gmra.mrb[48].mxu0 %v2152_v49 }
 0x12d   : > { %906 = vmatprep.mubr.bf16.mxu0 %v2153_v50 }
 0x134   : > { %907 = vmatmul.mubr.bf16.gmra.mrb[52].mxu0 %v2155_v53 }
 0x135   : > { %914 = vmatprep.mubr.bf16.mxu0 %v2156_v54 }
 0x13c   : > { %915 = vmatmul.mubr.bf16.gmra.mrb[56].mxu0 %v2158_v55 }
 0x13d   : > { %922 = vmatprep.mubr.bf16.mxu0 %v2159_v56 }
 0x144   : > { %923 = vmatmul.mubr.bf16.gmra.mrb[60].mxu0 %v2161_v57 }
 0x19f   : > { %v1752_v58 = vpop.f32.mrb[0].mxu0 }
 0x1a0   : > { %v1753_v60 = vpop.f32.mrb[1].mxu0 }
 0x1a1   : > { %v1754_v61 = vadd.f32 %v1753_v60, %v1752_v58  ;;  %v1755_v62 = vpop.f32.mrb[2].mxu0 }
 0x1a2   : > { %v1756_v63 = vpop.f32.mrb[3].mxu0 }
 0x1a3   : > { %v805_v0 = vadd.f32 %v1754_v61, %v2860_v59  ;;  %v1757_v1 = vadd.f32 %v1756_v63, %v1755_v62 }
 0x1a5   : > { %v808_v2 = vadd.f32 %v1757_v1, %v2860_v59  ;;  %v931_v3 = vmax.f32 %v805_v0, 0.0 }
 0x1a7   : > { %v932_v4 = vmax.f32 %v808_v2, 0.0  ;;  %v1758_v5 = vpop.f32.mrb[4].mxu0 }
 0x1a8   : > { %v1759_v6 = vpop.f32.mrb[5].mxu0 }
 0x1a9   : > { %v1760_v7 = vadd.f32 %v1759_v6, %v1758_v5  ;;  %v1761_v8 = vpop.f32.mrb[6].mxu0  ;;  %v2864_v9 = vpack.c.bf16 %v932_v4, %v931_v3 }
 0x1aa   : > { %v1762_v10 = vpop.f32.mrb[7].mxu0 }
 0x1ab   : > { %v813_v11 = vadd.f32 %v1760_v7, %v2860_v59  ;;  %v1763_v12 = vadd.f32 %v1762_v10, %v1761_v8  ;;  %1928 = vmatprep.mubr.bf16.mxu1 %v2864_v9 }
 0x1ad   : > { %v816_v13 = vadd.f32 %v1763_v12, %v2860_v59  ;;  %v933_v14 = vmax.f32 %v813_v11, 0.0 }
 0x1af   : > { %v934_v15 = vmax.f32 %v816_v13, 0.0  ;;  %v1764_v16 = vpop.f32.mrb[8].mxu0 }
 0x1b0   : > { %v1765_v17 = vpop.f32.mrb[9].mxu0 }
 0x1b1   : > { %v1766_v18 = vadd.f32 %v1765_v17, %v1764_v16  ;;  %v1767_v19 = vpop.f32.mrb[10].mxu0  ;;  %v2869_v20 = vpack.c.bf16 %v934_v15, %v933_v14 }
 0x1b2   : > { %v1768_v21 = vpop.f32.mrb[11].mxu0 }
 0x1b3   : > { %v821_v22 = vadd.f32 %v1766_v18, %v2860_v59  ;;  %v1769_v23 = vadd.f32 %v1768_v21, %v1767_v19  ;;  %1929 = vmatmul.mubr.bf16.vlgmr.msra.gmra.mrb[0].mxu1 %v2869_v20 }
 0x1b5   : > { %v824_v24 = vadd.f32 %v1769_v23, %v2860_v59  ;;  %v935_v25 = vmax.f32 %v821_v22, 0.0 }
 0x1b7   : > { %v936_v26 = vmax.f32 %v824_v24, 0.0  ;;  %v1770_v27 = vpop.f32.mrb[12].mxu0 }
 0x1b8   : > { %v1771_v28 = vpop.f32.mrb[13].mxu0 }
 0x1b9   : > { %v1772_v29 = vadd.f32 %v1771_v28, %v1770_v27  ;;  %v1773_v30 = vpop.f32.mrb[14].mxu0  ;;  %v2874_v31 = vpack.c.bf16 %v936_v26, %v935_v25 }
 0x1ba   : > { %v1774_v32 = vpop.f32.mrb[15].mxu0 }
 0x1bb   : > { %v829_v33 = vadd.f32 %v1772_v29, %v2860_v59  ;;  %v1775_v34 = vadd.f32 %v1774_v32, %v1773_v30  ;;  %1932 = vmatprep.mubr.bf16.mxu1 %v2874_v31 }
 0x1bd   : > { %v832_v35 = vadd.f32 %v1775_v34, %v2860_v59  ;;  %v937_v36 = vmax.f32 %v829_v33, 0.0 }
 0x1bf   : > { %v938_v37 = vmax.f32 %v832_v35, 0.0  ;;  %v1776_v38 = vpop.f32.mrb[16].mxu0 }
 0x1c0   : > { %v1777_v39 = vpop.f32.mrb[17].mxu0 }
 0x1c1   : > { %v1778_v40 = vadd.f32 %v1777_v39, %v1776_v38  ;;  %v1779_v41 = vpop.f32.mrb[18].mxu0  ;;  %v2879_v42 = vpack.c.bf16 %v938_v37, %v937_v36 }
 0x1c2   : > { %v1780_v43 = vpop.f32.mrb[19].mxu0 }
 0x1c3   : > { %v837_v44 = vadd.f32 %v1778_v40, %v2860_v59  ;;  %v1781_v45 = vadd.f32 %v1780_v43, %v1779_v41  ;;  %1933 = vmatmul.mubr.bf16.gmra.mrb[4].mxu1 %v2879_v42 }
 0x1c5   : > { %v840_v46 = vadd.f32 %v1781_v45, %v2860_v59  ;;  %v939_v47 = vmax.f32 %v837_v44, 0.0 }
 0x1c7   : > { %v940_v48 = vmax.f32 %v840_v46, 0.0  ;;  %v1782_v49 = vpop.f32.mrb[20].mxu0 }
 0x1c8   : > { %v1783_v50 = vpop.f32.mrb[21].mxu0 }
 0x1c9   : > { %v1784_v51 = vadd.f32 %v1783_v50, %v1782_v49  ;;  %v1785_v52 = vpop.f32.mrb[22].mxu0  ;;  %v2884_v53 = vpack.c.bf16 %v940_v48, %v939_v47 }
 0x1ca   : > { %v1786_v54 = vpop.f32.mrb[23].mxu0 }
 0x1cb   : > { %v845_v55 = vadd.f32 %v1784_v51, %v2860_v59  ;;  %v1787_v56 = vadd.f32 %v1786_v54, %v1785_v52  ;;  %1936 = vmatprep.mubr.bf16.mxu1 %v2884_v53 }
 0x1cd   : > { %v848_v57 = vadd.f32 %v1787_v56, %v2860_v59  ;;  %v941_v58 = vmax.f32 %v845_v55, 0.0 }
 0x1cf   : > { %v942_v60 = vmax.f32 %v848_v57, 0.0  ;;  %v1788_v61 = vpop.f32.mrb[24].mxu0 }
 0x1d0   : > { %v1789_v62 = vpop.f32.mrb[25].mxu0 }
 0x1d1   : > { %v1790_v63 = vadd.f32 %v1789_v62, %v1788_v61  ;;  %v1791_v0 = vpop.f32.mrb[26].mxu0  ;;  %v2889_v1 = vpack.c.bf16 %v942_v60, %v941_v58 }
 0x1d2   : > { %v1792_v2 = vpop.f32.mrb[27].mxu0 }
 0x1d3   : > { %v853_v3 = vadd.f32 %v1790_v63, %v2860_v59  ;;  %v1793_v4 = vadd.f32 %v1792_v2, %v1791_v0  ;;  %1937 = vmatmul.mubr.bf16.gmra.mrb[8].mxu1 %v2889_v1 }
 0x1d5   : > { %v856_v5 = vadd.f32 %v1793_v4, %v2860_v59  ;;  %v943_v6 = vmax.f32 %v853_v3, 0.0 }
 0x1d7   : > { %v944_v7 = vmax.f32 %v856_v5, 0.0  ;;  %v1794_v8 = vpop.f32.mrb[28].mxu0 }
 0x1d8   : > { %v1795_v10 = vpop.f32.mrb[29].mxu0 }
 0x1d9   : > { %v1796_v11 = vadd.f32 %v1795_v10, %v1794_v8  ;;  %v1797_v12 = vpop.f32.mrb[30].mxu0  ;;  %v2894_v13 = vpack.c.bf16 %v944_v7, %v943_v6 }
 0x1da   : > { %v1798_v14 = vpop.f32.mrb[31].mxu0 }
 0x1db   : > { %v861_v15 = vadd.f32 %v1796_v11, %v2860_v59  ;;  %v1799_v16 = vadd.f32 %v1798_v14, %v1797_v12  ;;  %1940 = vmatprep.mubr.bf16.mxu1 %v2894_v13 }
 0x1dd   : > { %v864_v17 = vadd.f32 %v1799_v16, %v2860_v59  ;;  %v945_v18 = vmax.f32 %v861_v15, 0.0 }
 0x1df   : > { %v946_v19 = vmax.f32 %v864_v17, 0.0  ;;  %v1800_v21 = vpop.f32.mrb[32].mxu0 }
 0x1e0   : > { %v1801_v22 = vpop.f32.mrb[33].mxu0 }
 0x1e1   : > { %v1802_v23 = vadd.f32 %v1801_v22, %v1800_v21  ;;  %v1803_v24 = vpop.f32.mrb[34].mxu0  ;;  %v2899_v25 = vpack.c.bf16 %v946_v19, %v945_v18 }
 0x1e2   : > { %v1804_v26 = vpop.f32.mrb[35].mxu0 }
 0x1e3   : > { %v869_v27 = vadd.f32 %v1802_v23, %v2860_v59  ;;  %v1805_v28 = vadd.f32 %v1804_v26, %v1803_v24  ;;  %1941 = vmatmul.mubr.bf16.gmra.mrb[12].mxu1 %v2899_v25 }
 0x1e5   : > { %v872_v29 = vadd.f32 %v1805_v28, %v2860_v59  ;;  %v947_v30 = vmax.f32 %v869_v27, 0.0 }
 0x1e7   : > { %v948_v32 = vmax.f32 %v872_v29, 0.0  ;;  %v1806_v33 = vpop.f32.mrb[36].mxu0 }
 0x1e8   : > { %v1807_v34 = vpop.f32.mrb[37].mxu0 }
 0x1e9   : > { %v1808_v35 = vadd.f32 %v1807_v34, %v1806_v33  ;;  %v1809_v36 = vpop.f32.mrb[38].mxu0  ;;  %v2904_v37 = vpack.c.bf16 %v948_v32, %v947_v30 }
 0x1ea   : > { %v1810_v38 = vpop.f32.mrb[39].mxu0 }
 0x1eb   : > { %v877_v39 = vadd.f32 %v1808_v35, %v2860_v59  ;;  %v1811_v40 = vadd.f32 %v1810_v38, %v1809_v36  ;;  %1944 = vmatprep.mubr.bf16.mxu1 %v2904_v37 }
 0x1ed   : > { %v880_v41 = vadd.f32 %v1811_v40, %v2860_v59  ;;  %v949_v43 = vmax.f32 %v877_v39, 0.0 }
 0x1ef   : > { %v950_v44 = vmax.f32 %v880_v41, 0.0  ;;  %v1812_v45 = vpop.f32.mrb[40].mxu0 }
 0x1f0   : > { %v1813_v46 = vpop.f32.mrb[41].mxu0 }
 0x1f1   : > { %v1814_v47 = vadd.f32 %v1813_v46, %v1812_v45  ;;  %v1815_v48 = vpop.f32.mrb[42].mxu0  ;;  %v2909_v49 = vpack.c.bf16 %v950_v44, %v949_v43 }
 0x1f2   : > { %v1816_v50 = vpop.f32.mrb[43].mxu0 }
 0x1f3   : > { %v885_v51 = vadd.f32 %v1814_v47, %v2860_v59  ;;  %v1817_v52 = vadd.f32 %v1816_v50, %v1815_v48  ;;  %1945 = vmatmul.mubr.bf16.gmra.mrb[16].mxu1 %v2909_v49 }
 0x1f5   : > { %v888_v54 = vadd.f32 %v1817_v52, %v2860_v59  ;;  %v951_v55 = vmax.f32 %v885_v51, 0.0 }
 0x1f7   : > { %v952_v56 = vmax.f32 %v888_v54, 0.0  ;;  %v1818_v57 = vpop.f32.mrb[44].mxu0 }
 0x1f8   : > { %v1819_v58 = vpop.f32.mrb[45].mxu0 }
 0x1f9   : > { %v1820_v60 = vadd.f32 %v1819_v58, %v1818_v57  ;;  %v1821_v61 = vpop.f32.mrb[46].mxu0  ;;  %v2914_v62 = vpack.c.bf16 %v952_v56, %v951_v55 }
 0x1fa   : > { %v1822_v63 = vpop.f32.mrb[47].mxu0 }
 0x1fb   : > { %v893_v0 = vadd.f32 %v1820_v60, %v2860_v59  ;;  %v1823_v2 = vadd.f32 %v1822_v63, %v1821_v61  ;;  %1948 = vmatprep.mubr.bf16.mxu1 %v2914_v62  ;;  %v2945_v61 = vld [vmem:[%s3258_s20] ss:$0 sm:$0xff] }
 0x1fd   : > { %v896_v3 = vadd.f32 %v1823_v2, %v2860_v59  ;;  %v953_v4 = vmax.f32 %v893_v0, 0.0 }
 0x1ff   : > { %v954_v5 = vmax.f32 %v896_v3, 0.0  ;;  %v1824_v6 = vpop.f32.mrb[48].mxu0 }
 0x200   : > { %v1825_v7 = vpop.f32.mrb[49].mxu0 }
 0x201   : > { %v1826_v8 = vadd.f32 %v1825_v7, %v1824_v6  ;;  %v1827_v10 = vpop.f32.mrb[50].mxu0  ;;  %v2919_v11 = vpack.c.bf16 %v954_v5, %v953_v4 }
 0x202   : > { %v1828_v12 = vpop.f32.mrb[51].mxu0 }
 0x203   : > { %v901_v14 = vadd.f32 %v1826_v8, %v2860_v59  ;;  %v1829_v15 = vadd.f32 %v1828_v12, %v1827_v10  ;;  %1949 = vmatmul.mubr.bf16.gmra.mrb[20].mxu1 %v2919_v11  ;;  %v2956_v8 = vld [vmem:[%s3259_s27] sm:$0x1]  ;;  %s3096_s27 = scalar_lea.hbm %s3262_s30, %s1735_s12 }
 0x205   : > { %v904_v16 = vadd.f32 %v1829_v15, %v2860_v59  ;;  %v955_v17 = vmax.f32 %v901_v14, 0.0 }
 0x207   : > { %v956_v18 = vmax.f32 %v904_v16, 0.0  ;;  %v1830_v19 = vpop.f32.mrb[52].mxu0 }
 0x208   : > { %v1831_v21 = vpop.f32.mrb[53].mxu0 }
 0x209   : > { %v1832_v22 = vadd.f32 %v1831_v21, %v1830_v19  ;;  %v1833_v23 = vpop.f32.mrb[54].mxu0  ;;  %v2924_v24 = vpack.c.bf16 %v956_v18, %v955_v17 }
 0x20a   : > { %v1834_v26 = vpop.f32.mrb[55].mxu0 }
 0x20b   : > { %v909_v27 = vadd.f32 %v1832_v22, %v2860_v59  ;;  %v1835_v28 = vadd.f32 %v1834_v26, %v1833_v23  ;;  %1952 = vmatprep.mubr.bf16.mxu1 %v2924_v24 }
 0x20d   : > { %v912_v29 = vadd.f32 %v1835_v28, %v2860_v59  ;;  %v957_v30 = vmax.f32 %v909_v27, 0.0 }
 0x20f   : > { %v958_v32 = vmax.f32 %v912_v29, 0.0  ;;  %v1836_v33 = vpop.f32.mrb[56].mxu0 }
 0x210   : > { %v1837_v34 = vpop.f32.mrb[57].mxu0 }
 0x211   : > { %v1838_v35 = vadd.f32 %v1837_v34, %v1836_v33  ;;  %v1839_v36 = vpop.f32.mrb[58].mxu0  ;;  %v2929_v38 = vpack.c.bf16 %v958_v32, %v957_v30 }
 0x212   : > { %v1840_v39 = vpop.f32.mrb[59].mxu0 }
 0x213   : > { %v917_v40 = vadd.f32 %v1838_v35, %v2860_v59  ;;  %v1841_v41 = vadd.f32 %v1840_v39, %v1839_v36  ;;  %1953 = vmatmul.mubr.bf16.gmra.mrb[24].mxu1 %v2929_v38 }
 0x215   : > { %v920_v43 = vadd.f32 %v1841_v41, %v2860_v59  ;;  %v959_v44 = vmax.f32 %v917_v40, 0.0 }
 0x217   : > { %v960_v45 = vmax.f32 %v920_v43, 0.0  ;;  %v1842_v46 = vpop.f32.mrb[60].mxu0 }
 0x218   : > { %v1843_v47 = vpop.f32.mrb[61].mxu0 }
 0x219   : > { %v1844_v48 = vadd.f32 %v1843_v47, %v1842_v46  ;;  %v1845_v50 = vpop.f32.mrb[62].mxu0  ;;  %v2934_v51 = vpack.c.bf16 %v960_v45, %v959_v44 }
 0x21a   : > { %v1846_v52 = vpop.f32.mrb[63].mxu0 }
 0x21b   : > { %v925_v54 = vadd.f32 %v1844_v48, %v2860_v59  ;;  %v1847_v55 = vadd.f32 %v1846_v52, %v1845_v50  ;;  %1956 = vmatprep.mubr.bf16.mxu1 %v2934_v51 }
 0x21d   : > { %v928_v56 = vadd.f32 %v1847_v55, %v2860_v59  ;;  %v961_v57 = vmax.f32 %v925_v54, 0.0 }
 0x21f   : > { %v962_v58 = vmax.f32 %v928_v56, 0.0 }
 0x221   : > { %v2939_v60 = vpack.c.bf16 %v962_v58, %v961_v57 }
 0x223   : > { %1957 = vmatmul.mubr.bf16.gmra.mrb[28].mxu1 %v2939_v60 }
 0x224   : > { %1888 = vmatprep.mubr.bf16.mxu1 %v2956_v8 }
 0x286   : > { %v1930_v63 = vpop.f32.mrb[0].mxu1 }
 0x287   : > { %v1093_v0 = vadd.f32 %v1930_v63, %v2945_v61  ;;  %v1084_v2 = vpop.f32.mrb[1].mxu1 }
 0x288   : > { %v1085_v3 = vadd.f32 %v2945_v61, %v1084_v2  ;;  %v1931_v4 = vpop.f32.mrb[2].mxu1 }
 0x289   : > { %2170 = vtanh.f32 %v1093_v0  ;;  %v1096_v59 = vadd.f32 %v1931_v4, %v2945_v61  ;;  %v1087_v5 = vpop.f32.mrb[3].mxu1 }
 0x28a   : > { %2172 = vtanh.f32 %v1085_v3  ;;  %v1088_v6 = vadd.f32 %v2945_v61, %v1087_v5 }
 0x28b   : > { %2174 = vtanh.f32 %v1096_v59 }
 0x28c   : > { %2176 = vtanh.f32 %v1088_v6 }
 0x293   : > { %v2951_v7 = vpop.eup %2170 }
 0x294   : > { %v2958_v10 = vpop.eup %2172 }
 0x295   : > { %v2961_v12 = vpop.eup %2174 }
 0x296   : > { %v2963_v14 = vpop.eup %2176  ;;  %v1934_v15 = vpop.f32.mrb[4].mxu1  ;;  %v1245_v16 = vpack.c.bf16 %v2961_v12, %v2951_v7 }
 0x297   : > { %v1109_v17 = vadd.f32 %v1934_v15, %v2945_v61  ;;  %v1100_v18 = vpop.f32.mrb[5].mxu1  ;;  %v1244_v19 = vpack.c.bf16 %v2963_v14, %v2958_v10 }
 0x298   : > { %v1101_v21 = vadd.f32 %v2945_v61, %v1100_v18  ;;  %v1935_v22 = vpop.f32.mrb[6].mxu1 }
 0x299   : > { %2178 = vtanh.f32 %v1109_v17  ;;  %v1112_v23 = vadd.f32 %v1935_v22, %v2945_v61  ;;  %v1103_v26 = vpop.f32.mrb[7].mxu1 }
 0x29a   : > { %2180 = vtanh.f32 %v1101_v21  ;;  %v1104_v27 = vadd.f32 %v2945_v61, %v1103_v26 }
 0x29b   : > { %2182 = vtanh.f32 %v1112_v23 }
 0x29c   : > { %2184 = vtanh.f32 %v1104_v27 }
 0x2a3   : > { %v2973_v28 = vpop.eup %2178 }
 0x2a4   : > { %v2975_v29 = vpop.eup %2180 }
 0x2a5   : > { %v2977_v30 = vpop.eup %2182 }
 0x2a6   : > { %v2979_v32 = vpop.eup %2184  ;;  %v1938_v33 = vpop.f32.mrb[8].mxu1  ;;  %v1247_v34 = vpack.c.bf16 %v2977_v30, %v2973_v28 }
 0x2a7   : > { %v1125_v35 = vadd.f32 %v1938_v33, %v2945_v61  ;;  %v1116_v36 = vpop.f32.mrb[9].mxu1  ;;  %v1246_v39 = vpack.c.bf16 %v2979_v32, %v2975_v29 }
 0x2a8   : > { %v1117_v40 = vadd.f32 %v2945_v61, %v1116_v36  ;;  %v1939_v41 = vpop.f32.mrb[10].mxu1 }
 0x2a9   : > { %2186 = vtanh.f32 %v1125_v35  ;;  %v1128_v43 = vadd.f32 %v1939_v41, %v2945_v61  ;;  %v1119_v44 = vpop.f32.mrb[11].mxu1 }
 0x2aa   : > { %2188 = vtanh.f32 %v1117_v40  ;;  %v1120_v45 = vadd.f32 %v2945_v61, %v1119_v44 }
 0x2ab   : > { %2190 = vtanh.f32 %v1128_v43 }
 0x2ac   : > { %2192 = vtanh.f32 %v1120_v45 }
 0x2b3   : > { %v2989_v46 = vpop.eup %2186 }
 0x2b4   : > { %v2991_v47 = vpop.eup %2188 }
 0x2b5   : > { %v2993_v48 = vpop.eup %2190 }
 0x2b6   : > { %v2995_v50 = vpop.eup %2192  ;;  %v1942_v52 = vpop.f32.mrb[12].mxu1  ;;  %v1249_v54 = vpack.c.bf16 %v2993_v48, %v2989_v46 }
 0x2b7   : > { %v1141_v55 = vadd.f32 %v1942_v52, %v2945_v61  ;;  %v1132_v56 = vpop.f32.mrb[13].mxu1  ;;  %v1248_v57 = vpack.c.bf16 %v2995_v50, %v2991_v47 }
 0x2b8   : > { %v1133_v58 = vadd.f32 %v2945_v61, %v1132_v56  ;;  %v1943_v63 = vpop.f32.mrb[14].mxu1 }
 0x2b9   : > { %2194 = vtanh.f32 %v1141_v55  ;;  %v1144_v0 = vadd.f32 %v1943_v63, %v2945_v61  ;;  %v1135_v2 = vpop.f32.mrb[15].mxu1 }
 0x2ba   : > { %2196 = vtanh.f32 %v1133_v58  ;;  %v1136_v3 = vadd.f32 %v2945_v61, %v1135_v2 }
 0x2bb   : > { %2198 = vtanh.f32 %v1144_v0 }
 0x2bc   : > { %2200 = vtanh.f32 %v1136_v3 }
 0x2c3   : > { %v3005_v4 = vpop.eup %2194 }
 0x2c4   : > { %v3007_v59 = vpop.eup %2196 }
 0x2c5   : > { %v3009_v5 = vpop.eup %2198 }
 0x2c6   : > { %v3011_v6 = vpop.eup %2200  ;;  %v1946_v15 = vpop.f32.mrb[16].mxu1  ;;  %v1251_v17 = vpack.c.bf16 %v3009_v5, %v3005_v4  ;;  %v1337_v4 = vld [vmem:[%s2808_s24] sm:$0x1] }
 0x2c7   : > { %v1157_v18 = vadd.f32 %v1946_v15, %v2945_v61  ;;  %v1148_v21 = vpop.f32.mrb[17].mxu1  ;;  %v1250_v22 = vpack.c.bf16 %v3011_v6, %v3007_v59 }
 0x2c8   : > { %v1149_v23 = vadd.f32 %v2945_v61, %v1148_v21  ;;  %v1947_v26 = vpop.f32.mrb[18].mxu1 }
 0x2c9   : > { %2202 = vtanh.f32 %v1157_v18  ;;  %v1160_v27 = vadd.f32 %v1947_v26, %v2945_v61  ;;  %v1151_v33 = vpop.f32.mrb[19].mxu1 }
 0x2ca   : > { %2204 = vtanh.f32 %v1149_v23  ;;  %v1152_v35 = vadd.f32 %v2945_v61, %v1151_v33 }
 0x2cb   : > { %2206 = vtanh.f32 %v1160_v27 }
 0x2cc   : > { %2208 = vtanh.f32 %v1152_v35 }
 0x2d3   : > { %v2203_v36 = vpop.eup %2202 }
 0x2d4   : > { %v2205_v40 = vpop.eup %2204 }
 0x2d5   : > { %v2207_v41 = vpop.eup %2206 }
 0x2d6   : > { %v2209_v43 = vpop.eup %2208  ;;  %v1950_v44 = vpop.f32.mrb[20].mxu1  ;;  %v1253_v45 = vpack.c.bf16 %v2207_v41, %v2203_v36 }
 0x2d7   : > { %v1173_v52 = vadd.f32 %v1950_v44, %v2945_v61  ;;  %v1164_v55 = vpop.f32.mrb[21].mxu1  ;;  %v1252_v56 = vpack.c.bf16 %v2209_v43, %v2205_v40 }
 0x2d8   : > { %v1165_v58 = vadd.f32 %v2945_v61, %v1164_v55  ;;  %v1951_v63 = vpop.f32.mrb[22].mxu1 }
 0x2d9   : > { %2210 = vtanh.f32 %v1173_v52  ;;  %v1176_v0 = vadd.f32 %v1951_v63, %v2945_v61  ;;  %v1167_v2 = vpop.f32.mrb[23].mxu1  ;;  %1872 = vmatprep.subr.bf16.mxu1 %v1252_v56 }
 0x2da   : > { %2212 = vtanh.f32 %v1165_v58  ;;  %v1168_v3 = vadd.f32 %v2945_v61, %v1167_v2  ;;  %1873 = vmatpush3.bf16.xpose.msra.mxu1 %v1244_v19 }
 0x2db   : > { %2214 = vtanh.f32 %v1176_v0  ;;  %1874 = vmatprep.subr.bf16.mxu1 %v1253_v45 }
 0x2dc   : > { %2216 = vtanh.f32 %v1168_v3 }
 0x2e2   : > { %1875 = vmatpush3.bf16.xpose.msra.mxu1 %v1245_v16 }
 0x2e3   : > { %v2211_v15 = vpop.eup %2210 }
 0x2e4   : > { %v2213_v18 = vpop.eup %2212 }
 0x2e5   : > { %v2215_v21 = vpop.eup %2214 }
 0x2e6   : > { %v2217_v23 = vpop.eup %2216  ;;  %v1954_v26 = vpop.f32.mrb[24].mxu1  ;;  %v1255_v27 = vpack.c.bf16 %v2215_v21, %v2211_v15 }
 0x2e7   : > { %v1189_v33 = vadd.f32 %v1954_v26, %v2945_v61  ;;  %v1180_v35 = vpop.f32.mrb[25].mxu1  ;;  %v1254_v36 = vpack.c.bf16 %v2217_v23, %v2213_v18 }
 0x2e8   : > { %v1181_v10 = vadd.f32 %v2945_v61, %v1180_v35  ;;  %v1955_v14 = vpop.f32.mrb[26].mxu1 }
 0x2e9   : > { %2218 = vtanh.f32 %v1189_v33  ;;  %v1192_v19 = vadd.f32 %v1955_v14, %v2945_v61  ;;  %v1183_v40 = vpop.f32.mrb[27].mxu1  ;;  %1876 = vmatprep.subr.bf16.mxu1 %v1254_v36 }
 0x2ea   : > { %2220 = vtanh.f32 %v1181_v10  ;;  %v1184_v7 = vadd.f32 %v2945_v61, %v1183_v40  ;;  %1877 = vmatpush3.bf16.xpose.msra.mxu1 %v1246_v39 }
 0x2eb   : > { %2222 = vtanh.f32 %v1192_v19  ;;  %1878 = vmatprep.subr.bf16.mxu1 %v1255_v27 }
 0x2ec   : > { %2224 = vtanh.f32 %v1184_v7 }
 0x2f2   : > { %1879 = vmatpush3.bf16.xpose.msra.mxu1 %v1247_v34 }
 0x2f3   : > { %v2219_v12 = vpop.eup %2218 }
 0x2f4   : > { %v2221_v16 = vpop.eup %2220 }
 0x2f5   : > { %v2223_v41 = vpop.eup %2222 }
 0x2f6   : > { %v2225_v43 = vpop.eup %2224  ;;  %v1958_v44 = vpop.f32.mrb[28].mxu1  ;;  %v1257_v45 = vpack.c.bf16 %v2223_v41, %v2219_v12 }
 0x2f7   : > { %v1205_v52 = vadd.f32 %v1958_v44, %v2945_v61  ;;  %v1196_v55 = vpop.f32.mrb[29].mxu1  ;;  %v1256_v56 = vpack.c.bf16 %v2225_v43, %v2221_v16 }
 0x2f8   : > { %v1197_v29 = vadd.f32 %v2945_v61, %v1196_v55  ;;  %v1959_v32 = vpop.f32.mrb[30].mxu1 }
 0x2f9   : > { %2226 = vtanh.f32 %v1205_v52  ;;  %v1208_v39 = vadd.f32 %v1959_v32, %v2945_v61  ;;  %v1199_v58 = vpop.f32.mrb[31].mxu1  ;;  %1880 = vmatprep.subr.bf16.mxu1 %v1256_v56 }
 0x2fa   : > { %2228 = vtanh.f32 %v1197_v29  ;;  %v1200_v28 = vadd.f32 %v2945_v61, %v1199_v58  ;;  %1881 = vmatpush3.bf16.xpose.msra.mxu1 %v1248_v57  ;;  %v2496_v57 = vmov 0  }
 0x2fb   : > { %2230 = vtanh.f32 %v1208_v39  ;;  %1882 = vmatprep.subr.bf16.mxu1 %v1257_v45  ;;  %2096 = vset.pattern.permute.xlu0 %v2496_v57 }
 0x2fc   : > { %2232 = vtanh.f32 %v1200_v28  ;;  %2097 = vset.pattern.permute.xlu1 %v2496_v57 }
 0x302   : > { %1883 = vmatpush3.bf16.xpose.msra.mxu1 %v1249_v54 }
 0x303   : > { %v2227_v30 = vpop.eup %2226 }
 0x304   : > { %v2229_v34 = vpop.eup %2228 }
 0x305   : > { %v2231_v63 = vpop.eup %2230 }
 0x306   : > { %v2233_v0 = vpop.eup %2232  ;;  %v1259_v2 = vpack.c.bf16 %v2231_v63, %v2227_v30 }
 0x307   : > { %v1258_v3 = vpack.c.bf16 %v2233_v0, %v2229_v34 }
 0x309   : > { %1884 = vmatprep.subr.bf16.mxu1 %v1258_v3 }
 0x30a   : > { %1885 = vmatpush3.bf16.xpose.msra.mxu1 %v1250_v22 }
 0x30b   : > { %1886 = vmatprep.subr.bf16.mxu1 %v1259_v2 }
 0x312   : > { %1887 = vmatpush3.bf16.xpose.msra.mxu1 %v1251_v17 }
 0x313   : > { %1890 = vmatprep.subr.bf16.mxu1 %v2904_v37 }
 0x319   : > { %1889 = vmatmul.mubr.bf16.vlgmr.msra.gmra.mrb[32].mxu1 %v2956_v8 }
 0x31a   : > { %1891 = vmatpush3.bf16.msra.mxu1 %v2864_v9  ;;  %v1301_v9 = vlaneseq }
 0x31b   : > { %1892 = vmatprep.subr.bf16.mxu1 %v2909_v49 }
 0x31c   : > { %vm1334_vm4 = vcmp.lt.s32.totalorder %v1301_v9, 256 }
 0x31e   : > { %1893 = vmatpush3.bf16.msra.mxu1 %v2869_v20  ;;  %v1302_v20 = vand.u32 127, %v1301_v9 }
 0x31f   : > { %1894 = vmatprep.subr.bf16.mxu1 %v2914_v62 }
 0x322   : > { %1895 = vmatpush3.bf16.msra.mxu1 %v2874_v31  ;;  %v1307_v31 = vstv %s1725_s9  ;;  %s2497_s9 = smov [#allocation8]  }
 0x323   : > { %1896 = vmatprep.subr.bf16.mxu1 %v2919_v11  ;;  %v3079_v11 = vshrl.u32 %v1301_v9, 7  ;;  %s2330_s26 = sshll.u32 %s2497_s9, 4  ;;  %s2331_s26 = int_to_ptr.vmem [resolvable:$false] %s2330_s26 }
 0x324   : > { %s2332_s0 = scalar_lea.vmem %s2331_s26, 64  ;;  %p2333_p8 = scmp.lt.s32.totalorder %s1457_s23, %s2331_s26 }
 0x325   : > { %v1355_v17 = vsub.s32 0, %v3079_v11  ;;  %p2334_p13 = scmp.lt.s32.totalorder %s2332_s0, %s2326_s1 }
 0x326   : > { %1897 = vmatpush3.bf16.msra.mxu1 %v2879_v42  ;;  %v1303_v42 = vadd.s32 128, %v1302_v20 }
 0x327   : > { %1898 = vmatprep.subr.bf16.mxu1 %v2924_v24  ;;  %p2335_p5 = por %p2334_p13, %p2333_p8 }
 0x328   : > { %v1309_v49 = vadd.s32 %v1307_v31, %v1303_v42 }
 0x329   : > { %p2336_p1 = pnand %p2335_p5, %p2329_p3 }
 0x32a   : > { %1899 = vmatpush3.bf16.msra.mxu1 %v2884_v53  ;;  %v2495_v53 = vmov 1966171168   ;;  %vm1311_vm2 = vcmp.lt.s32.totalorder %v1309_v49, 600 }
 0x32b   : > { %1900 = vmatprep.subr.bf16.mxu1 %v2929_v38  ;;  %v1318_v37 = vunpack.c.l.s4 %v2495_v53 }
 0x32d   : > { %v1319_v62 = vunpack.c.0.s8 %v1318_v37 }
 0x32e   : > { %1901 = vmatpush3.bf16.msra.mxu1 %v2889_v1  ;;  %v1308_v1 = vadd.s32 %v1307_v31, %v1302_v20 }
 0x32f   : > { %1902 = vmatprep.subr.bf16.mxu1 %v2934_v51  ;;  %v1322_v38 = vsub.s32 %v1319_v62, %v3079_v11 }
 0x330   : > { %vm1310_vm1 = vcmp.lt.s32.totalorder %v1308_v1, 600 }
 0x332   : > { %1903 = vmatpush3.bf16.msra.mxu1 %v2894_v13 }
 0x333   : > { %1904 = vmatprep.subr.bf16.mxu1 %v2939_v60 }
 0x336   : > { %1905 = vmatpush3.bf16.msra.mxu1 %v2899_v25 }
 0x3ec   : > { %v1294_v13 = vpop.f32.mrb[32].mxu1 }
 0x3ed   : > { %v1312_v25 = vsel %vm1310_vm1, %v1294_v13, -inf  ;;  %v1296_v24 = vpop.f32.mrb[33].mxu1 }
 0x3ee   : > { %v1313_v51 = vsel %vm1311_vm2, %v1296_v24, -inf  ;;  %v1298_v60 = vpop.f32.mrb[34].mxu1  ;;  %v1339_v61 = vsel %vm1338_vm3, %v1312_v25, -inf }
 0x3ef   : > { %v1316_v8 = vcombine.low %v1312_v25, %v1313_v51  ;;  %v1299_v46 = vpop.f32.mrb[35].mxu1  ;;  %v1340_v47 = vsel %vm1338_vm3, %v1313_v51, -inf }
 0x3f0   : > { %v1341_v48 = vmax.f32 %v1339_v61, %v1340_v47 }
 0x3f1   : > { %v1323_v50 = vrot.slane %v1316_v8, %v1322_v38 }
 0x3f2   : > { %1342 = vmax.xlane.f32.xlu0 %v1341_v48 }
 0x3f3   : > { %v1330_v54 = vrot.slane %v1323_v50, %v1322_v38 }
 0x3f5   : > { %1336 = vst.msk [vmem:[%s2815_s22] sm:$0x3] %vm1334_vm4, %v1330_v54 }
 0x47f   : > { %v1343_v59 = vpop.xlane.xlu0 %1342 }
 0x480   : > { %v1344_v5 = vmax.f32 %v1337_v4, %v1343_v59 }
 0x482   : > { %v1345_v6 = vsub.f32 %v1337_v4, %v1344_v5  ;;  %1428 = vst.msk [vmem:[%s2808_s24] sm:$0x1] %vm1371_vm5, %v1344_v5  ;;  %1350 = vperm.xlu0 %2096, %v1344_v5  }
 0x484   : > { %v1346_v40 = vmul.f32 1.442695, %v1345_v6 }
 0x501   : > { %v1351_v22 = vpop.permute.xlu0 %1350 }
 0x502   : > { %v1356_v15 = vrot.slane %v1351_v22, %v1355_v17 }
 0x504   : > { %v1357_v18 = vsub.f32 %v1312_v25, %v1356_v15  ;;  %v1358_v21 = vsub.f32 %v1313_v51, %v1356_v15 }
 0x506   : > { %v1359_v23 = vmul.f32 1.442695, %v1357_v18  ;;  %v1361_v26 = vmul.f32 1.442695, %v1358_v21 }
 0x508   : > { %2234 = vpow2.f32 %v1359_v23 }
 0x509   : > { %2236 = vpow2.f32 %v1361_v26 }
 0x50a   : > { %2238 = vpow2.f32 %v1346_v40 }
 0x512   : > { %v2235_v27 = vpop.eup %2234 }
 0x513   : > { %v2237_v33 = vpop.eup %2236  ;;  %v1384_v35 = vpack.c.bf16 %v2235_v27, %v2235_v27  ;;  %v1365_v36 = vsel %vm1338_vm3, %v2235_v27, 0.0 }
 0x514   : > { %v1385_v10 = vpack.c.bf16 %v2237_v33, %v2237_v33  ;;  %v1366_v14 = vsel %vm1338_vm3, %v2237_v33, 0.0  ;;  %v2239_v7 = vpop.eup %2238 }
 0x515   : > { %v1367_v19 = vadd.f32 %v1366_v14, %v1365_v36 }
 0x516   : > { %1418 = vmatprep.mubr.bf16.mxu1 %v1385_v10 }
 0x517   : > { %1419 = vmatmul.mubr.bf16.vlgmr.msra.gmra.mrb[36].mxu1 %v1384_v35  ;;  %1368 = vadd.xlane.f32.xlu1 %v1367_v19 }
 0x528   : > { %1376 = vperm.xlu1 %2097, %v2239_v7  }
 0x529   : > { %2339 = shalt.err (!%p2336_p1)
}
 0x52a   : > { %s2340_s17 = scalar_lea.hbm %s3096_s27, 32  ;;  %s2344_s12 = scalar_lea.hbm %s3263_s6, 128 }
 0x52b   : > { %p2341_p2 = scmp.ne.s32.totalorder %s3096_s27, %s2340_s17  ;;  %p2345_p7 = scmp.lt.u32.totalorder %s3096_s27, %s3263_s6 }
 0x52c   : > { %p2346_p4 = scmp.lt.u32.totalorder %s2344_s12, %s2340_s17  ;;  %p2348_p11 = scmp.lt.u32.totalorder %s2340_s17, %s3096_s27 }
 0x52d   : > { %p2342_p10 = pnand %p2341_p2, %p2717_p0 }
 0x52e   : > { %p2347_p9 = por %p2346_p4, %p2345_p7 }
 0x52f   : > { %p2343_p6 = pneg %p2342_p10 }
 0x530   : > { %p2349_p12 = por %p2348_p11, %p2347_p9 }
 0x532   : > { %p2350_p3 = pnand %p2349_p12, %p2343_p6 }
 0x534   : > { %2353 = shalt.err (!%p2350_p3)
}
 0x535   : > { %1970 = dma.vmem_to_hbm [thread:$0]  (%p2717_p0), %s1457_s23, 32, %s3096_s27, %s1430_s21   ;;  %v1363_v12 = vld [vmem:[%s2813_s2] sm:$0x1] }
 0x536   : > { %v1364_v16 = vmul.f32 %v2239_v7, %v1363_v12  ;;  %v1373_v52 = vld [vmem:[%s2819_s28] sm:$0x1]  ;;  %s3264_s0 = sld [smem:[#allocation20_spill]]  ;;  %s1730_s24 = sshll.u32 %s2472_s16, 4 }
 0x537   : > { %s1475_s20 = sshll.u32 %s2819_s28, 4  ;;  %s3265_s27 = sld [smem:[#allocation30_spill]]  ;;  %s3127_s20 = int_to_ptr.vmem [resolvable:$true] %s1475_s20 }
 0x538   : > { %s2354_s16 = scalar_lea.vmem %s3127_s20, 16  ;;  %s2498_s9 = smov [#allocation9]  }
 0x539   : > { %p2355_p0 = scmp.ne.s32.totalorder %s3127_s20, %s2354_s16  ;;  %s2358_s17 = sshll.u32 %s2498_s9, 4  ;;  %s2359_s17 = int_to_ptr.vmem [resolvable:$false] %s2358_s17 }
 0x53a   : > { %s2360_s22 = scalar_lea.vmem %s2359_s17, 32  ;;  %p2361_p1 = scmp.lt.s32.totalorder %s3127_s20, %s2359_s17 }
 0x53b   : > { %p2362_p2 = scmp.lt.s32.totalorder %s2360_s22, %s2354_s16 }
 0x53c   : > { %p3267_p8 = scmp.ne.s32.totalorder %s3264_s0, 0 }
 0x53d   : > { %s3125_s21 = scalar_lea.hbm %s3265_s27, %s1730_s24  ;;  %p2363_p10 = por %p2362_p2, %p2361_p1 }
 0x53e   : > { %p2356_p13 = pnand %p2355_p0, %p3267_p8 }
 0x540   : > { %p2357_p5 = pneg %p2356_p13 }
 0x542   : > { %p2364_p6 = pnand %p2363_p10, %p2357_p5 }
 0x5a4   : > { %v1369_v41 = vpop.xlane.xlu1 %1368 }
 0x5a5   : > { %v1370_v43 = vadd.f32 %v1369_v41, %v1364_v16 }
 0x5a7   : > { %1372 = vst.msk [vmem:[%s2813_s2] sm:$0x1] %vm1371_vm5, %v1370_v43  ;;  %s3266_s2 = sand.u32 1, %s2448_s10  }
 0x5a8   : > { %v1377_v44 = vpop.permute.xlu1 %1376  ;;  %s1441_s1 = scalar_lea.sflag [#allocation10], %s3266_s2 }
 0x5a9   : > { %v1382_v45 = vrot.slane %v1377_v44, %v1355_v17 }
 0x5ab   : > { %v1383_v29 = vmul.f32 %v1382_v45, %v1373_v52 }
 0x5ea   : > { %v1906_v55 = vpop.f32.mrb[36].mxu1 }
 0x5eb   : > { %v1907_v56 = vpop.f32.mrb[37].mxu1 }
 0x5ec   : > { %v1908_v32 = vadd.f32 %v1907_v56, %v1906_v55  ;;  %v1909_v39 = vpop.f32.mrb[38].mxu1 }
 0x5ed   : > { %v1910_v58 = vpop.f32.mrb[39].mxu1 }
 0x5ee   : > { %v1426_v28 = vadd.f32 %v1908_v32, %v1383_v29 }
 0x5f0   : > { %1427 = vst [vmem:[%s2819_s28] sm:$0x1] %v1426_v28 }
 0x5f1   : > { %2367 = shalt.err (!%p2364_p6)
}
 0x5f2   : > { %s2368_s28 = scalar_lea.hbm %s3125_s21, 16  ;;  %s2372_s29 = scalar_lea.hbm %s3265_s27, 32 }
 0x5f3   : > { %p2369_p7 = scmp.ne.s32.totalorder %s3125_s21, %s2368_s28  ;;  %p2373_p11 = scmp.lt.u32.totalorder %s3125_s21, %s3265_s27 }
 0x5f4   : > { %p2374_p12 = scmp.lt.u32.totalorder %s2372_s29, %s2368_s28  ;;  %p2376_p0 = scmp.lt.u32.totalorder %s2368_s28, %s3125_s21 }
 0x5f5   : > { %p2370_p4 = pnand %p2369_p7, %p3267_p8 }
 0x5f6   : > { %p2375_p3 = por %p2374_p12, %p2373_p11 }
 0x5f7   : > { %p2371_p9 = pneg %p2370_p4 }
 0x5f8   : > { %p2377_p13 = por %p2376_p0, %p2375_p3 }
 0x5fa   : > { %p2378_p5 = pnand %p2377_p13, %p2371_p9 }
 0x5fc   : > { %2381 = shalt.err (!%p2378_p5)
}
 0x5fd   : > { %1971 = dma.vmem_to_hbm [thread:$0]  (%p3267_p8), %s3127_s20, 16, %s3125_s21, %s1441_s1  }
 0x5fe PF: > { %s3268_s23 = sld [smem:[#allocation16_spill]]  ;;  %s3269_s30 = sld [smem:[#allocation19_spill]] }
 0x5ff   : > { %p1997_p1 = scmp.ge.s32.totalorder %s2484_s19, 2 }
 0x604   : > { %s1487_s2 = sand.u32 1, %s3268_s23   ;;  %p3270_p2 = scmp.ne.s32.totalorder %s3269_s30, 0 }
 0x605   : > { %s1488_s16 = scalar_lea.sflag [#allocation4], %s1487_s2 }
 0x606   : > { %p1986_p10 = pnand %p1997_p1, %p3270_p2 }
 0x608   : > { %2435 = dma.done.wait (!%p1986_p10), %s1488_s16, 32  }
 0x609   : > { %2437 = vsyncadd (!%p1986_p10), %s1488_s16, 4294967264  ;;  %s3271_s9 = sld [smem:[#allocation15_spill]]  ;;  %s3272_s17 = sld [smem:[#allocation21_spill]] }
 0x60f   : > { %s1508_s22 = sand.u32 1, %s3271_s9   ;;  %p3273_p6 = scmp.ne.s32.totalorder %s3272_s17, 0 }
 0x610   : > { %s1509_s0 = scalar_lea.sflag [#allocation10], %s1508_s22 }
 0x611   : > { %p1989_p7 = pnand %p1997_p1, %p3273_p6 }
 0x613   : > { %2439 = dma.done.wait (!%p1989_p7), %s1509_s0, 16  }
 0x614   : > { %2441 = vsyncadd (!%p1989_p7), %s1509_s0, 4294967280  ;;  %s30_s19 = sadd.s32 1, %s2484_s19   ;;  %s3274_s20 = sld [smem:[#allocation18_spill]] }
 0x615   : > { %p27_p8 = scmp.ge.s32.totalorder %s30_s19, 6   ;;  %s3275_s21 = smov %s3287_s15 }
 0x616   : > { %s3276_s30 = smov %s2448_s10  ;;  %s3277_s10 = smov %s2452_s11 }
 0x617   : > { %s3278_s11 = smov %s2736_s4  ;;  %s3279_s12 = smov %s2460_s13 }
 0x618   : > { %s3280_s13 = smov %s2464_s14  ;;  %s3281_s14 = smov %s2739_s5 }
 0x619   : > { %s3283_s16 = smov %s2480_s18  ;;  %s3284_s17 = smov %s3275_s21 }
 0x61a   : > { %s3282_s15 = smov %s3274_s20  ;;  %s3285_s18 = smov %s3291_s25 }
 0x61b   :  { %29 = sbr.rel (!%p27_p8) target bundleno = 21 (0x15), region = 142 }
 0x622   :  { %1513 = vsyncpa [#allocation3], 1 }
 0x623   :  { %1515 = vsyncpa [#allocation3 + $0x1], 1 }
 0x624   :  { %1516 = vsyncpa [#allocation6], 1 }
 0x625   :  { %1517 = vsyncpa [#allocation4], 1 }
 0x626   :  { %1519 = vsyncpa [#allocation4 + $0x1], 1 }
 0x627   :  { %1520 = vsyncpa [#allocation10], 1 }
 0x628   :  { %1522 = vsyncpa [#allocation10 + $0x1], 1 }

</bundles_post_ra>
